<compile_context>
chip_gen: v7x
topology: tpu7x:2x2x1
jax: 0.10.0
libtpu: 0.0.40
codegen_flags: <defaults>
</compile_context>

<pallas_src>
import jax
import jax.numpy as jnp
from jax.experimental import pallas as pl
from jax.experimental.pallas import tpu as pltpu

_BN_EPS = 1e-5
_TAIL = 8   # spare rows appended to the hidden-band scratch (covers K <= 9)


def _relu6(x):
    return jnp.minimum(jnp.maximum(x, 0.0), 6.0)


# ---------------------------------------------------------------------------
# Fused MBConv kernel (one grid step = one batch item x one band of output rows)
# ---------------------------------------------------------------------------
def _make_mbconv_kernel(*, conv_shortcut, tile_h, th_in, wp, wout, ksize, stride):
    K = ksize
    n_rows = th_in * wp          # halo'd input band (flat pixels, padded width)
    band_rows = tile_h * wp      # output band (flat pixels, padded width)

    def kernel(*refs):
        if conv_shortcut:
            (xflat_ref, mask_ref, xs_ref,
             w1_ref, b1_ref, w2_ref, b2_ref, w3_ref, b3_ref,
             wsc_ref, bsc_ref, o_ref, hid_sc, hid2_sc) = refs
        else:
            (xflat_ref, mask_ref, xs_ref,
             w1_ref, b1_ref, w2_ref, b2_ref, w3_ref, b3_ref,
             o_ref, hid_sc, hid2_sc) = refs

        hidden = hid_sc.shape[1]
        hb = pl.program_id(1)
        row_span = tile_h * stride * wp              # flat rows advanced per h-tile
        flat_start = pl.multiple_of(hb * row_span, row_span)

        # --- conv1 (1x1, BN scale pre-folded into w1) + bias + relu6 ----------
        xt = xflat_ref[pl.ds(flat_start, n_rows), :]     # (n_rows, cin)
        msk = mask_ref[pl.ds(flat_start, n_rows), :]     # (n_rows, 1); 0 at spatial pad
        hid = jnp.dot(xt, w1_ref[...], preferred_element_type=jnp.float32)
        hid = _relu6(hid + b1_ref[...]) * msk            # zero-padded hidden activation
        hid_sc[pl.ds(0, n_rows), :] = hid
        if stride == 1:
            # Tail rows are read by the vectorized taps (only feeding discarded
            # padded columns); keep them zero for determinism.
            hid_sc[pl.ds(n_rows, _TAIL), :] = jnp.zeros((_TAIL, hidden), jnp.float32)

        # --- depthwise KxK (BN scale folded into taps) + bias + relu6 ---------
        taps = [w2_ref[pl.ds(t, 1), :] for t in range(K * K)]   # hoisted: K*K loads
        b2 = b2_ref[...]

        if stride == 1:
            # Vectorized over all output rows: dest flat m = j*wp + c, source flat
            # index = m + (kh*wp + kw).  Junk columns c >= wout are discarded later.
            acc = None
            for kh in range(K):
                for kw in range(K):
                    win = hid_sc[pl.ds(kh * wp + kw, band_rows), :]
                    term = win * taps[kh * K + kw]
                    acc = term if acc is None else acc + term
            hid2_sc[...] = _relu6(acc + b2)
        else:
            hid2_sc[...] = jnp.zeros_like(hid2_sc)       # keep junk columns defined
            for j in range(tile_h):                      # static, unrolled
                acc = None
                for kh in range(K):
                    base = (j * stride + kh) * wp
                    for kw in range(K):
                        win = hid_sc[pl.ds(base + kw, wout, stride=stride), :]
                        term = win * taps[kh * K + kw]
                        acc = term if acc is None else acc + term
                hid2_sc[pl.ds(j * wp, wout), :] = _relu6(acc + b2)

        # --- conv3 (1x1) + bias, shortcut, add, relu6 -------------------------
        main = jnp.dot(hid2_sc[...], w3_ref[...],
                       preferred_element_type=jnp.float32) + b3_ref[...]
        xs = xs_ref[...]                                 # (band_rows, cin)
        if conv_shortcut:
            sc = jnp.dot(xs, wsc_ref[...],
                         preferred_element_type=jnp.float32) + bsc_ref[...]
        else:
            sc = xs                                      # identity: plain VPU add
        o_ref[...] = _relu6(main + sc).astype(o_ref.dtype)

    return kernel


# ---------------------------------------------------------------------------
# BN folding, tile picking, parameter init
# ---------------------------------------------------------------------------
def _fold_bn(bn, eps=_BN_EPS):
    scale = bn["gamma"] / jnp.sqrt(bn["var"] + eps)
    bias = bn["beta"] - bn["mean"] * scale
    return scale.astype(jnp.float32), bias.astype(jnp.float32)


def _pick_tile_h(hout, wp, tile_h=None):
    if tile_h is None:
        tile_h = max(1, 2048 // max(wp, 1))    # ~2K flattened pixels per tile
    tile_h = min(tile_h, hout)
    for th in range(tile_h, 0, -1):
        # need hout % th == 0 and an 8-aligned second-minor block (or full extent)
        if hout % th == 0 and ((th * wp) % 8 == 0 or th == hout):
            return th
    return hout


def init_params(key, in_planes, hidden, out_planes, K):
    ks = jax.random.split(key, 8)

    def conv_w(k, shape, fan_in):
        return jax.random.normal(k, shape, jnp.float32) / jnp.sqrt(fan_in)

    def bn_p(k, c):
        k1, k2, k3, k4 = jax.random.split(k, 4)
        return dict(
            gamma=1.0 + 0.1 * jax.random.normal(k1, (c,), jnp.float32),
            beta=0.1 * jax.random.normal(k2, (c,), jnp.float32),
            mean=0.1 * jax.random.normal(k3, (c,), jnp.float32),
            var=jnp.abs(1.0 + 0.1 * jax.random.normal(k4, (c,), jnp.float32)),
        )

    return dict(
        w1=conv_w(ks[0], (hidden, in_planes, 1, 1), in_planes),       # OIHW
        w2=conv_w(ks[1], (hidden, 1, K, K), K * K),                   # depthwise
        w3=conv_w(ks[2], (out_planes, hidden, 1, 1), hidden),
        wsc=conv_w(ks[3], (out_planes, in_planes, 1, 1), in_planes),
        bn1=bn_p(ks[4], hidden),
        bn2=bn_p(ks[5], hidden),
        bn3=bn_p(ks[6], out_planes),
        bnsc=bn_p(ks[7], out_planes),
    )


# ---------------------------------------------------------------------------
# Forward pass (wrapper): NCHW in, NCHW out
# ---------------------------------------------------------------------------
def residual_block_forward(x_nchw, p, *, stride, K, in_planes, out_planes,
                           tile_h=None):
    x = jnp.transpose(x_nchw, (0, 2, 3, 1)).astype(jnp.float32)       # -> NHWC
    n, h, w, cin = x.shape
    hidden = p["w1"].shape[0]
    pad = K // 2
    hp, wp = h + 2 * pad, w + 2 * pad
    hout = (h + 2 * pad - K) // stride + 1
    wout = (w + 2 * pad - K) // stride + 1
    assert K - 1 <= _TAIL

    conv_shortcut = (stride != 1) or (in_planes != out_planes)

    # Fold BN scales into the conv weights; only per-channel biases stay in-kernel.
    s1, b1 = _fold_bn(p["bn1"])
    s2, b2 = _fold_bn(p["bn2"])
    s3, b3 = _fold_bn(p["bn3"])
    w1s = jnp.transpose(p["w1"][:, :, 0, 0], (1, 0)) * s1[None, :]            # (cin, hid)
    w2s = jnp.transpose(p["w2"][:, 0, :, :].reshape(hidden, K * K), (1, 0)) \
        * s2[None, :]                                                         # (K*K, hid)
    w3s = jnp.transpose(p["w3"][:, :, 0, 0], (1, 0)) * s3[None, :]            # (hid, cout)

    # Spatially zero-padded input, flattened so kernel matmuls stay 2D (pixels, chans).
    xp = jnp.pad(x, ((0, 0), (pad, pad), (pad, pad), (0, 0)))
    xflat = xp.reshape(n, hp * wp, cin)
    # Mask that zeros the hidden activation at padded spatial positions.
    msk = jnp.pad(jnp.ones((h, w), jnp.float32), ((pad, pad), (pad, pad)))
    msk = msk.reshape(hp * wp, 1)
    # Shortcut input: strided spatial subsample, padded to the kernel's padded-width
    # flat layout (junk columns are discarded by the final wrapper slice).
    xs = x[:, ::stride, ::stride, :]                                   # (n,hout,wout,cin)
    xs = jnp.pad(xs, ((0, 0), (0, 0), (0, wp - wout), (0, 0)))
    xs = xs.reshape(n, hout * wp, cin)

    th = _pick_tile_h(hout, wp, tile_h)
    th_in = (th - 1) * stride + K
    n_ht = hout // th

    args = [xflat, msk, xs,
            w1s, b1.reshape(1, hidden),
            w2s, b2.reshape(1, hidden),
            w3s, b3.reshape(1, out_planes)]
    in_specs = [
        pl.BlockSpec((None, hp * wp, cin), lambda i, j: (i, 0, 0)),   # resident per n
        pl.BlockSpec((hp * wp, 1), lambda i, j: (0, 0)),
        pl.BlockSpec((None, th * wp, cin), lambda i, j: (i, j, 0)),
        pl.BlockSpec((cin, hidden), lambda i, j: (0, 0)),
        pl.BlockSpec((1, hidden), lambda i, j: (0, 0)),
        pl.BlockSpec((K * K, hidden), lambda i, j: (0, 0)),
        pl.BlockSpec((1, hidden), lambda i, j: (0, 0)),
        pl.BlockSpec((hidden, out_planes), lambda i, j: (0, 0)),
        pl.BlockSpec((1, out_planes), lambda i, j: (0, 0)),
    ]
    flops = (2 * n * h * w * cin * hidden
             + 2 * n * hout * wout * hidden * K * K
             + 2 * n * hout * wp * hidden * out_planes)
    if conv_shortcut:
        ssc, bsc = _fold_bn(p["bnsc"])
        wscs = jnp.transpose(p["wsc"][:, :, 0, 0], (1, 0)) * ssc[None, :]     # (cin, cout)
        args += [wscs, bsc.reshape(1, out_planes)]
        in_specs += [pl.BlockSpec((cin, out_planes), lambda i, j: (0, 0)),
                     pl.BlockSpec((1, out_planes), lambda i, j: (0, 0))]
        flops += 2 * n * hout * wp * cin * out_planes
    else:
        assert cin == out_planes, "identity shortcut requires in_planes == out_planes"

    bytes_accessed = 4 * (xflat.size + msk.size + xs.size
                          + n * hout * wp * out_planes
                          + w1s.size + w2s.size + w3s.size)

    kernel = _make_mbconv_kernel(conv_shortcut=conv_shortcut, tile_h=th,
                                 th_in=th_in, wp=wp, wout=wout,
                                 ksize=K, stride=stride)

    out_flat = pl.pallas_call(
        kernel,
        out_shape=jax.ShapeDtypeStruct((n, hout * wp, out_planes), jnp.float32),
        grid=(n, n_ht),
        in_specs=in_specs,
        out_specs=pl.BlockSpec((None, th * wp, out_planes),
                               lambda i, j: (i, j, 0)),
        scratch_shapes=[pltpu.VMEM((th_in * wp + _TAIL, hidden), jnp.float32),
                        pltpu.VMEM((th * wp, hidden), jnp.float32)],
        compiler_params=pltpu.CompilerParams(
            dimension_semantics=("parallel", "parallel"),
            vmem_limit_bytes=32 * 1024 * 1024),
        cost_estimate=pl.CostEstimate(flops=int(flops), transcendentals=0,
                                      bytes_accessed=int(bytes_accessed)),
    )(*args)

    # Drop the padded width columns; XLA fuses this slice into the NCHW transpose copy.
    out = out_flat.reshape(n, hout, wp, out_planes)[:, :, :wout, :]
    return jnp.transpose(out, (0, 3, 1, 2))                           # -> NCHW


# ---------------------------------------------------------------------------
# Pure-JAX reference (mirrors the PyTorch forward in NCHW, eval-mode BN)
# ---------------------------------------------------------------------------
def residual_block_ref(x, p, *, stride, K, in_planes, out_planes, eps=_BN_EPS):
    def bn(y, bp):
        s = bp["gamma"] / jnp.sqrt(bp["var"] + eps)
        b = bp["beta"] - bp["mean"] * s
        return y * s[None, :, None, None] + b[None, :, None, None]

    def conv(xx, ww, stride=1, pad=0, groups=1):
        return jax.lax.conv_general_dilated(
            xx, ww, (stride, stride), [(pad, pad), (pad, pad)],
            dimension_numbers=("NCHW", "OIHW", "NCHW"),
            feature_group_count=groups)

    r6 = lambda z: jnp.clip(z, 0.0, 6.0)
    out = r6(bn(conv(x, p["w1"]), p["bn1"]))
    out = r6(bn(conv(out, p["w2"], stride=stride, pad=K // 2,
                     groups=p["w2"].shape[0]), p["bn2"]))
    out = bn(conv(out, p["w3"]), p["bn3"])
    if stride != 1 or in_planes != out_planes:
        sc = bn(conv(x, p["wsc"], stride=stride), p["bnsc"])
    else:
        sc = x
    return r6(out + sc)


if __name__ == "__main__":
    key = jax.random.PRNGKey(0)

    configs = [
        # conv shortcut, stride 1
        dict(in_planes=8, hidden=16, expansion=2.0, K=3, stride=1,
             N=2, H=16, W=16, tile_h=8),
        # identity shortcut, stride 1
        dict(in_planes=16, hidden=32, expansion=0.5, K=3, stride=1,
             N=2, H=16, W=16, tile_h=4),
        # conv shortcut, stride 2
        dict(in_planes=8, hidden=16, expansion=2.0, K=3, stride=2,
             N=2, H=16, W=16, tile_h=4),
    ]

    for cfg in configs:
        key, kx, kp = jax.random.split(key, 3)
        in_planes, hidden = cfg["in_planes"], cfg["hidden"]
        K, stride = cfg["K"], cfg["stride"]
        out_planes = round(hidden * cfg["expansion"])

        x = jax.random.normal(kx, (cfg["N"], in_planes, cfg["H"], cfg["W"]),
                              jnp.float32)
        params = init_params(kp, in_planes, hidden, out_planes, K)

        out = residual_block_forward(x, params, stride=stride, K=K,
                                     in_planes=in_planes, out_planes=out_planes,
                                     tile_h=cfg["tile_h"])
        out = jax.block_until_ready(out)

        ref = residual_block_ref(x, params, stride=stride, K=K,
                                 in_planes=in_planes, out_planes=out_planes)
        assert out.shape == ref.shape
        err = float(jnp.max(jnp.abs(out - ref)))
        assert err < 5e-4, f"max abs err {err} for cfg {cfg}"

    print("KERNEL_OK")
</pallas_src>

<mosaic_0001>
module attributes {stable_mosaic.version = 11 : i64} {
  func.func @kernel(%arg0: i32, %arg1: i32, %arg2: memref<1x324x8xf32, #tpu.memory_space<vmem>>, %arg3: memref<324x1xf32, #tpu.memory_space<vmem>>, %arg4: memref<1x144x8xf32, #tpu.memory_space<vmem>>, %arg5: memref<8x16xf32, #tpu.memory_space<vmem>>, %arg6: memref<1x16xf32, #tpu.memory_space<vmem>>, %arg7: memref<9x16xf32, #tpu.memory_space<vmem>>, %arg8: memref<1x16xf32, #tpu.memory_space<vmem>>, %arg9: memref<16x32xf32, #tpu.memory_space<vmem>>, %arg10: memref<1x32xf32, #tpu.memory_space<vmem>>, %arg11: memref<8x32xf32, #tpu.memory_space<vmem>>, %arg12: memref<1x32xf32, #tpu.memory_space<vmem>>, %arg13: memref<1x144x32xf32, #tpu.memory_space<vmem>>, %arg14: memref<188x16xf32, #tpu.memory_space<vmem>>, %arg15: memref<144x16xf32, #tpu.memory_space<vmem>>) attributes {dimension_semantics = [#tpu.dimension_semantics<parallel>, #tpu.dimension_semantics<parallel>], iteration_bounds = array<i64: 2, 2>, scalar_prefetch = 0 : i64, scratch_operands = 2 : i64, tpu.core_type = #tpu.core_type<tc>, window_params = [{transform_indices = @transform_0, window_bounds = array<i64: 1, 324, 8>}, {pipeline_mode = #tpu.pipeline_mode<synchronous>, transform_indices = @transform_1, window_bounds = array<i64: 324, 1>}, {transform_indices = @transform_2, window_bounds = array<i64: 1, 144, 8>}, {pipeline_mode = #tpu.pipeline_mode<synchronous>, transform_indices = @transform_3, window_bounds = array<i64: 8, 16>}, {pipeline_mode = #tpu.pipeline_mode<synchronous>, transform_indices = @transform_4, window_bounds = array<i64: 1, 16>}, {pipeline_mode = #tpu.pipeline_mode<synchronous>, transform_indices = @transform_5, window_bounds = array<i64: 9, 16>}, {pipeline_mode = #tpu.pipeline_mode<synchronous>, transform_indices = @transform_6, window_bounds = array<i64: 1, 16>}, {pipeline_mode = #tpu.pipeline_mode<synchronous>, transform_indices = @transform_7, window_bounds = array<i64: 16, 32>}, {pipeline_mode = #tpu.pipeline_mode<synchronous>, transform_indices = @transform_8, window_bounds = array<i64: 1, 32>}, {pipeline_mode = #tpu.pipeline_mode<synchronous>, transform_indices = @transform_9, window_bounds = array<i64: 8, 32>}, {pipeline_mode = #tpu.pipeline_mode<synchronous>, transform_indices = @transform_10, window_bounds = array<i64: 1, 32>}, {transform_indices = @transform_11, window_bounds = array<i64: 1, 144, 32>}]} {
    %c144_i32 = arith.constant 144 : i32
    %0 = arith.muli %arg1, %c144_i32 : i32
    %1 = tpu.assume_multiple %0, 144 : i32
    %c0 = arith.constant 0 : index
    %2 = arith.index_cast %1 : i32 to index
    %c0_0 = arith.constant 0 : index
    %3 = vector.load %arg2[%c0, %2, %c0_0] : memref<1x324x8xf32, #tpu.memory_space<vmem>>, vector<1x180x8xf32>
    %4 = vector.shape_cast %3 : vector<1x180x8xf32> to vector<180x8xf32>
    %5 = arith.index_cast %1 : i32 to index
    %c0_1 = arith.constant 0 : index
    %6 = vector.load %arg3[%5, %c0_1] : memref<324x1xf32, #tpu.memory_space<vmem>>, vector<180x1xf32>
    %c0_2 = arith.constant 0 : index
    %c0_3 = arith.constant 0 : index
    %7 = vector.load %arg5[%c0_2, %c0_3] : memref<8x16xf32, #tpu.memory_space<vmem>>, vector<8x16xf32>
    %cst = arith.constant dense<0.000000e+00> : vector<180x16xf32>
    %8 = tpu.matmul %4, %7, %cst {dimension_numbers = #tpu.dot_dimension_numbers<[1], [0], [0], [1], [0, 0, 1, 1], [], []>} : vector<180x8xf32>, vector<8x16xf32>, vector<180x16xf32> -> vector<180x16xf32>
    %c0_4 = arith.constant 0 : index
    %c0_5 = arith.constant 0 : index
    %9 = vector.load %arg6[%c0_4, %c0_5] : memref<1x16xf32, #tpu.memory_space<vmem>>, vector<1x16xf32>
    %10 = vector.broadcast %9 : vector<1x16xf32> to vector<180x16xf32>
    %11 = arith.addf %8, %10 : vector<180x16xf32>
    %cst_6 = arith.constant 0.000000e+00 : f32
    %12 = vector.broadcast %cst_6 : f32 to vector<180x16xf32>
    %13 = arith.maximumf %11, %12 : vector<180x16xf32>
    %cst_7 = arith.constant 6.000000e+00 : f32
    %14 = vector.broadcast %cst_7 : f32 to vector<180x16xf32>
    %15 = arith.minimumf %13, %14 : vector<180x16xf32>
    %16 = vector.broadcast %6 : vector<180x1xf32> to vector<180x16xf32>
    %17 = arith.mulf %15, %16 : vector<180x16xf32>
    %c0_8 = arith.constant 0 : index
    %c0_9 = arith.constant 0 : index
    %18 = vector.load %arg14[%c0_8, %c0_9] : memref<188x16xf32, #tpu.memory_space<vmem>>, vector<180x16xf32>
    tpu.vector_store %arg14[%c0_8, %c0_9], %17 {strides = array<i32>} : memref<188x16xf32, #tpu.memory_space<vmem>>, vector<180x16xf32>,
    %cst_10 = arith.constant 0.000000e+00 : f32
    %19 = vector.broadcast %cst_10 : f32 to vector<8x16xf32>
    %c180 = arith.constant 180 : index
    %c0_11 = arith.constant 0 : index
    %20 = vector.load %arg14[%c180, %c0_11] : memref<188x16xf32, #tpu.memory_space<vmem>>, vector<8x16xf32>
    tpu.vector_store %arg14[%c180, %c0_11], %19 {strides = array<i32>} : memref<188x16xf32, #tpu.memory_space<vmem>>, vector<8x16xf32>,
    %c0_12 = arith.constant 0 : index
    %c0_13 = arith.constant 0 : index
    %21 = vector.load %arg7[%c0_12, %c0_13] : memref<9x16xf32, #tpu.memory_space<vmem>>, vector<1x16xf32>
    %c1 = arith.constant 1 : index
    %c0_14 = arith.constant 0 : index
    %22 = vector.load %arg7[%c1, %c0_14] : memref<9x16xf32, #tpu.memory_space<vmem>>, vector<1x16xf32>
    %c2 = arith.constant 2 : index
    %c0_15 = arith.constant 0 : index
    %23 = vector.load %arg7[%c2, %c0_15] : memref<9x16xf32, #tpu.memory_space<vmem>>, vector<1x16xf32>
    %c3 = arith.constant 3 : index
    %c0_16 = arith.constant 0 : index
    %24 = vector.load %arg7[%c3, %c0_16] : memref<9x16xf32, #tpu.memory_space<vmem>>, vector<1x16xf32>
    %c4 = arith.constant 4 : index
    %c0_17 = arith.constant 0 : index
    %25 = vector.load %arg7[%c4, %c0_17] : memref<9x16xf32, #tpu.memory_space<vmem>>, vector<1x16xf32>
    %c5 = arith.constant 5 : index
    %c0_18 = arith.constant 0 : index
    %26 = vector.load %arg7[%c5, %c0_18] : memref<9x16xf32, #tpu.memory_space<vmem>>, vector<1x16xf32>
    %c6 = arith.constant 6 : index
    %c0_19 = arith.constant 0 : index
    %27 = vector.load %arg7[%c6, %c0_19] : memref<9x16xf32, #tpu.memory_space<vmem>>, vector<1x16xf32>
    %c7 = arith.constant 7 : index
    %c0_20 = arith.constant 0 : index
    %28 = vector.load %arg7[%c7, %c0_20] : memref<9x16xf32, #tpu.memory_space<vmem>>, vector<1x16xf32>
    %c8 = arith.constant 8 : index
    %c0_21 = arith.constant 0 : index
    %29 = vector.load %arg7[%c8, %c0_21] : memref<9x16xf32, #tpu.memory_space<vmem>>, vector<1x16xf32>
    %c0_22 = arith.constant 0 : index
    %c0_23 = arith.constant 0 : index
    %30 = vector.load %arg8[%c0_22, %c0_23] : memref<1x16xf32, #tpu.memory_space<vmem>>, vector<1x16xf32>
    %c0_24 = arith.constant 0 : index
    %c0_25 = arith.constant 0 : index
    %31 = vector.load %arg14[%c0_24, %c0_25] : memref<188x16xf32, #tpu.memory_space<vmem>>, vector<144x16xf32>
    %32 = vector.broadcast %21 : vector<1x16xf32> to vector<144x16xf32>
    %33 = arith.mulf %31, %32 : vector<144x16xf32>
    %c1_26 = arith.constant 1 : index
    %c0_27 = arith.constant 0 : index
    %34 = vector.load %arg14[%c1_26, %c0_27] : memref<188x16xf32, #tpu.memory_space<vmem>>, vector<144x16xf32>
    %35 = vector.broadcast %22 : vector<1x16xf32> to vector<144x16xf32>
    %36 = arith.mulf %34, %35 : vector<144x16xf32>
    %37 = arith.addf %33, %36 : vector<144x16xf32>
    %c2_28 = arith.constant 2 : index
    %c0_29 = arith.constant 0 : index
    %38 = vector.load %arg14[%c2_28, %c0_29] : memref<188x16xf32, #tpu.memory_space<vmem>>, vector<144x16xf32>
    %39 = vector.broadcast %23 : vector<1x16xf32> to vector<144x16xf32>
    %40 = arith.mulf %38, %39 : vector<144x16xf32>
    %41 = arith.addf %37, %40 : vector<144x16xf32>
    %c18 = arith.constant 18 : index
    %c0_30 = arith.constant 0 : index
    %42 = vector.load %arg14[%c18, %c0_30] : memref<188x16xf32, #tpu.memory_space<vmem>>, vector<144x16xf32>
    %43 = vector.broadcast %24 : vector<1x16xf32> to vector<144x16xf32>
    %44 = arith.mulf %42, %43 : vector<144x16xf32>
    %45 = arith.addf %41, %44 : vector<144x16xf32>
    %c19 = arith.constant 19 : index
    %c0_31 = arith.constant 0 : index
    %46 = vector.load %arg14[%c19, %c0_31] : memref<188x16xf32, #tpu.memory_space<vmem>>, vector<144x16xf32>
    %47 = vector.broadcast %25 : vector<1x16xf32> to vector<144x16xf32>
    %48 = arith.mulf %46, %47 : vector<144x16xf32>
    %49 = arith.addf %45, %48 : vector<144x16xf32>
    %c20 = arith.constant 20 : index
    %c0_32 = arith.constant 0 : index
    %50 = vector.load %arg14[%c20, %c0_32] : memref<188x16xf32, #tpu.memory_space<vmem>>, vector<144x16xf32>
    %51 = vector.broadcast %26 : vector<1x16xf32> to vector<144x16xf32>
    %52 = arith.mulf %50, %51 : vector<144x16xf32>
    %53 = arith.addf %49, %52 : vector<144x16xf32>
    %c36 = arith.constant 36 : index
    %c0_33 = arith.constant 0 : index
    %54 = vector.load %arg14[%c36, %c0_33] : memref<188x16xf32, #tpu.memory_space<vmem>>, vector<144x16xf32>
    %55 = vector.broadcast %27 : vector<1x16xf32> to vector<144x16xf32>
    %56 = arith.mulf %54, %55 : vector<144x16xf32>
    %57 = arith.addf %53, %56 : vector<144x16xf32>
    %c37 = arith.constant 37 : index
    %c0_34 = arith.constant 0 : index
    %58 = vector.load %arg14[%c37, %c0_34] : memref<188x16xf32, #tpu.memory_space<vmem>>, vector<144x16xf32>
    %59 = vector.broadcast %28 : vector<1x16xf32> to vector<144x16xf32>
    %60 = arith.mulf %58, %59 : vector<144x16xf32>
    %61 = arith.addf %57, %60 : vector<144x16xf32>
    %c38 = arith.constant 38 : index
    %c0_35 = arith.constant 0 : index
    %62 = vector.load %arg14[%c38, %c0_35] : memref<188x16xf32, #tpu.memory_space<vmem>>, vector<144x16xf32>
    %63 = vector.broadcast %29 : vector<1x16xf32> to vector<144x16xf32>
    %64 = arith.mulf %62, %63 : vector<144x16xf32>
    %65 = arith.addf %61, %64 : vector<144x16xf32>
    %66 = vector.broadcast %30 : vector<1x16xf32> to vector<144x16xf32>
    %67 = arith.addf %65, %66 : vector<144x16xf32>
    %cst_36 = arith.constant 0.000000e+00 : f32
    %68 = vector.broadcast %cst_36 : f32 to vector<144x16xf32>
    %69 = arith.maximumf %67, %68 : vector<144x16xf32>
    %cst_37 = arith.constant 6.000000e+00 : f32
    %70 = vector.broadcast %cst_37 : f32 to vector<144x16xf32>
    %71 = arith.minimumf %69, %70 : vector<144x16xf32>
    %c0_38 = arith.constant 0 : index
    %c0_39 = arith.constant 0 : index
    %72 = vector.load %arg15[%c0_38, %c0_39] : memref<144x16xf32, #tpu.memory_space<vmem>>, vector<144x16xf32>
    tpu.vector_store %arg15[%c0_38, %c0_39], %71 {strides = array<i32>} : memref<144x16xf32, #tpu.memory_space<vmem>>, vector<144x16xf32>,
    %c0_40 = arith.constant 0 : index
    %c0_41 = arith.constant 0 : index
    %73 = vector.load %arg15[%c0_40, %c0_41] : memref<144x16xf32, #tpu.memory_space<vmem>>, vector<144x16xf32>
    %c0_42 = arith.constant 0 : index
    %c0_43 = arith.constant 0 : index
    %74 = vector.load %arg9[%c0_42, %c0_43] : memref<16x32xf32, #tpu.memory_space<vmem>>, vector<16x32xf32>
    %cst_44 = arith.constant dense<0.000000e+00> : vector<144x32xf32>
    %75 = tpu.matmul %73, %74, %cst_44 {dimension_numbers = #tpu.dot_dimension_numbers<[1], [0], [0], [1], [0, 0, 1, 1], [], []>} : vector<144x16xf32>, vector<16x32xf32>, vector<144x32xf32> -> vector<144x32xf32>
    %c0_45 = arith.constant 0 : index
    %c0_46 = arith.constant 0 : index
    %76 = vector.load %arg10[%c0_45, %c0_46] : memref<1x32xf32, #tpu.memory_space<vmem>>, vector<1x32xf32>
    %77 = vector.broadcast %76 : vector<1x32xf32> to vector<144x32xf32>
    %78 = arith.addf %75, %77 : vector<144x32xf32>
    %c0_47 = arith.constant 0 : index
    %c0_48 = arith.constant 0 : index
    %c0_49 = arith.constant 0 : index
    %79 = vector.load %arg4[%c0_47, %c0_48, %c0_49] : memref<1x144x8xf32, #tpu.memory_space<vmem>>, vector<1x144x8xf32>
    %80 = vector.shape_cast %79 : vector<1x144x8xf32> to vector<144x8xf32>
    %c0_50 = arith.constant 0 : index
    %c0_51 = arith.constant 0 : index
    %81 = vector.load %arg11[%c0_50, %c0_51] : memref<8x32xf32, #tpu.memory_space<vmem>>, vector<8x32xf32>
    %cst_52 = arith.constant dense<0.000000e+00> : vector<144x32xf32>
    %82 = tpu.matmul %80, %81, %cst_52 {dimension_numbers = #tpu.dot_dimension_numbers<[1], [0], [0], [1], [0, 0, 1, 1], [], []>} : vector<144x8xf32>, vector<8x32xf32>, vector<144x32xf32> -> vector<144x32xf32>
    %c0_53 = arith.constant 0 : index
    %c0_54 = arith.constant 0 : index
    %83 = vector.load %arg12[%c0_53, %c0_54] : memref<1x32xf32, #tpu.memory_space<vmem>>, vector<1x32xf32>
    %84 = vector.broadcast %83 : vector<1x32xf32> to vector<144x32xf32>
    %85 = arith.addf %82, %84 : vector<144x32xf32>
    %86 = arith.addf %78, %85 : vector<144x32xf32>
    %cst_55 = arith.constant 0.000000e+00 : f32
    %87 = vector.broadcast %cst_55 : f32 to vector<144x32xf32>
    %88 = arith.maximumf %86, %87 : vector<144x32xf32>
    %cst_56 = arith.constant 6.000000e+00 : f32
    %89 = vector.broadcast %cst_56 : f32 to vector<144x32xf32>
    %90 = arith.minimumf %88, %89 : vector<144x32xf32>
    %c0_57 = arith.constant 0 : index
    %c0_58 = arith.constant 0 : index
    %c0_59 = arith.constant 0 : index
    %91 = vector.load %arg13[%c0_57, %c0_58, %c0_59] : memref<1x144x32xf32, #tpu.memory_space<vmem>>, vector<1x144x32xf32>
    %92 = vector.shape_cast %91 : vector<1x144x32xf32> to vector<144x32xf32>
    %93 = vector.shape_cast %90 : vector<144x32xf32> to vector<1x144x32xf32>
    tpu.vector_store %arg13[%c0_57, %c0_58, %c0_59], %93 {strides = array<i32>} : memref<1x144x32xf32, #tpu.memory_space<vmem>>, vector<1x144x32xf32>,
    return
  }
  func.func @transform_0(%arg0: i32, %arg1: i32) -> (i32, i32, i32) {
    %c0_i32 = arith.constant 0 : i32
    %c0_i32_0 = arith.constant 0 : i32
    %c0_i32_1 = arith.constant 0 : i32
    return %arg0, %c0_i32, %c0_i32_0 : i32, i32, i32
  }
  func.func @transform_1(%arg0: i32, %arg1: i32) -> (i32, i32) {
    %c0_i32 = arith.constant 0 : i32
    %c0_i32_0 = arith.constant 0 : i32
    %c0_i32_1 = arith.constant 0 : i32
    return %c0_i32, %c0_i32_0 : i32, i32
  }
  func.func @transform_2(%arg0: i32, %arg1: i32) -> (i32, i32, i32) {
    %c0_i32 = arith.constant 0 : i32
    %c0_i32_0 = arith.constant 0 : i32
    return %arg0, %arg1, %c0_i32 : i32, i32, i32
  }
  func.func @transform_3(%arg0: i32, %arg1: i32) -> (i32, i32) {
    %c0_i32 = arith.constant 0 : i32
    %c0_i32_0 = arith.constant 0 : i32
    %c0_i32_1 = arith.constant 0 : i32
    return %c0_i32, %c0_i32_0 : i32, i32
  }
  func.func @transform_4(%arg0: i32, %arg1: i32) -> (i32, i32) {
    %c0_i32 = arith.constant 0 : i32
    %c0_i32_0 = arith.constant 0 : i32
    %c0_i32_1 = arith.constant 0 : i32
    return %c0_i32, %c0_i32_0 : i32, i32
  }
  func.func @transform_5(%arg0: i32, %arg1: i32) -> (i32, i32) {
    %c0_i32 = arith.constant 0 : i32
    %c0_i32_0 = arith.constant 0 : i32
    %c0_i32_1 = arith.constant 0 : i32
    return %c0_i32, %c0_i32_0 : i32, i32
  }
  func.func @transform_6(%arg0: i32, %arg1: i32) -> (i32, i32) {
    %c0_i32 = arith.constant 0 : i32
    %c0_i32_0 = arith.constant 0 : i32
    %c0_i32_1 = arith.constant 0 : i32
    return %c0_i32, %c0_i32_0 : i32, i32
  }
  func.func @transform_7(%arg0: i32, %arg1: i32) -> (i32, i32) {
    %c0_i32 = arith.constant 0 : i32
    %c0_i32_0 = arith.constant 0 : i32
    %c0_i32_1 = arith.constant 0 : i32
    return %c0_i32, %c0_i32_0 : i32, i32
  }
  func.func @transform_8(%arg0: i32, %arg1: i32) -> (i32, i32) {
    %c0_i32 = arith.constant 0 : i32
    %c0_i32_0 = arith.constant 0 : i32
    %c0_i32_1 = arith.constant 0 : i32
    return %c0_i32, %c0_i32_0 : i32, i32
  }
  func.func @transform_9(%arg0: i32, %arg1: i32) -> (i32, i32) {
    %c0_i32 = arith.constant 0 : i32
    %c0_i32_0 = arith.constant 0 : i32
    %c0_i32_1 = arith.constant 0 : i32
    return %c0_i32, %c0_i32_0 : i32, i32
  }
  func.func @transform_10(%arg0: i32, %arg1: i32) -> (i32, i32) {
    %c0_i32 = arith.constant 0 : i32
    %c0_i32_0 = arith.constant 0 : i32
    %c0_i32_1 = arith.constant 0 : i32
    return %c0_i32, %c0_i32_0 : i32, i32
  }
  func.func @transform_11(%arg0: i32, %arg1: i32) -> (i32, i32, i32) {
    %c0_i32 = arith.constant 0 : i32
    %c0_i32_0 = arith.constant 0 : i32
    return %arg0, %arg1, %c0_i32 : i32, i32, i32
  }
}

</mosaic_0001>

<bundles_post_ra>
// kernel: tpu_custom_call.1
= control target key start
LH: loop header
LB: loop body
LE: loop exit
PB: predicated region body
PF: predicated region fallthrough
CT: control target
= control target key end

     0   :  { %s2669_s17 = smov 0   ;;  %s2671_s18 = smov 0   ;;  %s3477_s0 = inlined_call_operand.vmem [shape: f32[2,324,8], index: 0, kind: input, shape index: {}]   ;;  %s3478_s1 = inlined_call_operand.vmem [shape: f32[324,1], index: 1, kind: input, shape index: {}]   ;;  %s3479_s2 = inlined_call_operand.vmem [shape: f32[2,288,8], index: 2, kind: input, shape index: {}]   ;;  %s3480_s3 = inlined_call_operand.vmem [shape: f32[8,16], index: 3, kind: input, shape index: {}]   ;;  %s3481_s4 = inlined_call_operand.vmem [shape: f32[1,16], index: 4, kind: input, shape index: {}]   ;;  %s3482_s5 = inlined_call_operand.vmem [shape: f32[9,16], index: 5, kind: input, shape index: {}]   ;;  %s3483_s6 = inlined_call_operand.vmem [shape: f32[1,16], index: 6, kind: input, shape index: {}]   ;;  %s3484_s7 = inlined_call_operand.vmem [shape: f32[16,32], index: 7, kind: input, shape index: {}]   ;;  %s3485_s8 = inlined_call_operand.vmem [shape: f32[1,32], index: 8, kind: input, shape index: {}]   ;;  %s3486_s9 = inlined_call_operand.vmem [shape: f32[8,32], index: 9, kind: input, shape index: {}]   ;;  %s3487_s10 = inlined_call_operand.vmem [shape: f32[1,32], index: 10, kind: input, shape index: {}]   ;;  %s3488_s11 = inlined_call_operand.vmem [shape: f32[2,288,32], index: 11, kind: output, shape index: {}]  }
   0x1   :  { %s2673_s19 = smov 0   ;;  %s2675_s20 = smov 0  }
   0x2   :  { %s2677_s21 = smov 0  }
   0x3 LB: > { %s30_s22 = sadd.s32 1, %s2596_s19  ;;  %s33_s23 = sadd.s32 1, %s2600_s20  ;;  %s2604_s21 = sphi %s2677_s21, %s21_s21   ;;  %s2600_s20 = sphi %s2675_s20, %s3493_s20   ;;  %s2596_s19 = sphi %s2673_s19, %s3492_s19   ;;  %s2592_s18 = sphi %s2671_s18, %s3491_s18   ;;  %s2588_s17 = sphi %s2669_s17, %s3490_s17  }
   0x4   : > { %p31_p0 = scmp.ge.s32.totalorder %s30_s22, 2  ;;  %p2177_p1 = scmp.ge.s32.totalorder %s2604_s21, 1 }
   0x5   : > { %p368_p2 = scmp.lt.s32.totalorder %s2604_s21, 5 }
   0x6   : > { %s3495_s22 = smov (%p31_p0, %s30_s22), 0  ;;  %s3497_s23 = smov (!%p31_p0, %s33_s23), %s2600_s20 }
   0x7   : > { %p369_p3 = pnand %p2177_p1, %p368_p2  ;;  %p35_p4 = scmp.ge.s32.totalorder %s3497_s23, 2 }
   0x8   : > { %v495_v0 = vld [vmem:[%s3480_s3] sm:$0xff] (!%p369_p3)  ;;  %p421_p5 = scmp.lt.s32.totalorder (!%p369_p3), %s2592_s18, 1  ;;  %v2606_v1 = vmov (!%p369_p3), 0.0   ;;  %vm2607_vm0 = vmmov (!%p369_p3), 0   ;;  %s446_s26 = smul.u32 (!%p369_p3), 144, %s2588_s17  ;;  %v2608_v2 = vmov (!%p369_p3), 0  }
   0x9   : > { %s3499_s23 = smov (%p35_p4, %s3497_s23), 0  ;;  %372 = sbr.rel (%p369_p3) target bundleno = 640 (0x280), region = 64 }
   0xa   : > { %2318 = vmatprep.subr.mxu0 (!%p369_p3), %v2606_v1  ;;  %2320 = vmatprep.mubr.msk.f32.mxu0 (!%p369_p3), %vm2607_vm0, %v2606_v1  ;;  %s2716_s29 = scalar_lea.vmem (!%p369_p3), %s3478_s1, %s446_s26  ;;  %vm503_vm1 = vcmask (!%p369_p3), 64512   ;;  %vm937_vm2 = vcmask (!%p369_p3), 130048   ;;  %v1541_v51 = vld [vmem:[%s3484_s7] sm:$0xff] (!%p369_p3)  ;;  %v1542_v52 = vld [vmem:[%s3484_s7 + $0x8] sm:$0xff] (!%p369_p3)  ;;  %vm960_vm3 = vcmask (!%p369_p3), 125952   ;;  %vm2048_vm4 = vcmask (!%p369_p3), 261120  }
   0xb   : > { %2319 = vmatpush3.msra.mxu0 (!%p369_p3), %v495_v0  ;;  %2453 = vmatprep.subr.mxu1 (!%p369_p3), %v2606_v1  ;;  %v472_v3 = vld [vmem:[%s2716_s29] sm:$0xff] (!%p369_p3)  ;;  %v474_v4 = vld [vmem:[%s2716_s29 + $0x10] sm:$0xff] (!%p369_p3)  ;;  %v473_v5 = vld [vmem:[%s2716_s29 + $0x8] sm:$0xff] (!%p369_p3)  ;;  %962 = vst.msk [vmem:[#allocation2 + $0xb4] sm:$0xff] (!%p369_p3), %vm937_vm2, %v2606_v1  ;;  %v2449_v53 = vpack.c.bf16 (!%p369_p3), %v1542_v52, %v1541_v51 }
   0xc   : > { %2454 = vmatpush3.msra.mxu1 (!%p369_p3), %v495_v0  ;;  %2383 = vmatprep.mubr.msk.f32.mxu1 (!%p369_p3), %vm2607_vm0, %v2606_v1  ;;  %v475_v6 = vld [vmem:[%s2716_s29 + $0x18] sm:$0xff] (!%p369_p3)  ;;  %v476_v10 = vld [vmem:[%s2716_s29 + $0x20] sm:$0xff] (!%p369_p3)  ;;  %v477_v11 = vld [vmem:[%s2716_s29 + $0x28] sm:$0xff] (!%p369_p3) }
   0xd   : > { %2554 = vset.pattern.permute.xlu0 (!%p369_p3), %v2608_v2  ;;  %2555 = vset.pattern.permute.xlu1 (!%p369_p3), %v2608_v2  ;;  %v478_v14 = vld [vmem:[%s2716_s29 + $0x30] sm:$0xff] (!%p369_p3)  ;;  %v479_v15 = vld [vmem:[%s2716_s29 + $0x38] sm:$0xff] (!%p369_p3)  ;;  %v480_v17 = vld [vmem:[%s2716_s29 + $0x40] sm:$0xff] (!%p369_p3) }
   0xe   : > { %801 = vperm.xlu0 (!%p369_p3), %2554, %v472_v3   ;;  %811 = vperm.xlu1 (!%p369_p3), %2555, %v474_v4   ;;  %v481_v18 = vld [vmem:[%s2716_s29 + $0x48] sm:$0xff] (!%p369_p3)  ;;  %v482_v20 = vld [vmem:[%s2716_s29 + $0x50] sm:$0xff] (!%p369_p3)  ;;  %v483_v21 = vld [vmem:[%s2716_s29 + $0x58] sm:$0xff] (!%p369_p3) }
   0xf   : > { %v484_v23 = vld [vmem:[%s2716_s29 + $0x60] sm:$0xff] (!%p369_p3)  ;;  %v485_v24 = vld [vmem:[%s2716_s29 + $0x68] sm:$0xff] (!%p369_p3)  ;;  %v486_v26 = vld [vmem:[%s2716_s29 + $0x70] sm:$0xff] (!%p369_p3)  ;;  %2450 = vmatprep.subr.bf16.mxu1 (!%p369_p3), %v2449_v53 }
  0x10   : > { %s3501_s18 = smov (!%p421_p5, %s2592_s18), 1  ;;  %v487_v27 = vld [vmem:[%s2716_s29 + $0x78] sm:$0xff]  ;;  %v488_v29 = vld [vmem:[%s2716_s29 + $0x80] sm:$0xff]  ;;  %v489_v30 = vld [vmem:[%s2716_s29 + $0x88] sm:$0xff] }
  0x11   : > { %s2509_s30 = smul.u32 328, %s3501_s18  ;;  %v490_v32 = vld [vmem:[%s2716_s29 + $0x90] sm:$0xff]  ;;  %v491_v33 = vld [vmem:[%s2716_s29 + $0x98] sm:$0xff]  ;;  %v492_v35 = vld [vmem:[%s2716_s29 + $0xa0] sm:$0xff] }
  0x12   : > { %806 = vperm.xlu0 %2554, %v473_v5   ;;  %816 = vperm.xlu1 %2555, %v475_v6   ;;  %v493_v36 = vld [vmem:[%s2716_s29 + $0xa8] sm:$0xff]  ;;  %v494_v38 = vld [vmem:[%s2716_s29 + $0xb0] sm:$0xf]  ;;  %v2878_v6 = vld [vmem:[%s3481_s4] ss:$0 sm:$0xff]  ;;  %s2510_s16 = smul.u32 36, %s3501_s18 }
  0x13   : > { %s425_s14 = scalar_lea.vmem %s3477_s0, %s2509_s30  ;;  %v2907_v52 = vld [vmem:[%s3482_s5 + $0x1] ss:$0 sm:$0xff] }
  0x14   : > { %s2725_s15 = scalar_lea.vmem %s425_s14, %s446_s26  ;;  %s426_s14 = smul.u32 18, %s2588_s17 }
  0x15   : > { %v448_v7 = vld [vmem:[%s2725_s15] sm:$0xff]  ;;  %v449_v8 = vld [vmem:[%s2725_s15 + $0x8] sm:$0xff]  ;;  %v470_v12 = vld [vmem:[%s2725_s15 + $0xb0] sm:$0xf] }
  0x16   : > { %2321 = vmatmul.mubr.msk.f32.vlgmr.msra.gmra.mrb[0].mxu0 %vm503_vm1, %v448_v7  ;;  %v469_v9 = vld [vmem:[%s2725_s15 + $0xa8] sm:$0xff]  ;;  %v450_v13 = vld [vmem:[%s2725_s15 + $0x10] sm:$0xff]  ;;  %821 = vperm.xlu0 %2554, %v476_v10   ;;  %v451_v16 = vld [vmem:[%s2725_s15 + $0x18] sm:$0xff]  ;;  %p3325_p6 = scmp.lt.s32.totalorder %s426_s14, 35 }
  0x17   : > { %2323 = vmatprep.mubr.msk.f32.mxu0 %vm2607_vm0, %v2606_v1  ;;  %2384 = vmatmul.mubr.msk.f32.vlgmr.msra.gmra.mrb[0].mxu1 %vm503_vm1, %v469_v9  ;;  %v452_v19 = vld [vmem:[%s2725_s15 + $0x20] sm:$0xff]  ;;  %v453_v22 = vld [vmem:[%s2725_s15 + $0x28] sm:$0xff]  ;;  %v454_v25 = vld [vmem:[%s2725_s15 + $0x30] sm:$0xff] }
  0x18   : > { %2386 = vmatprep.mubr.msk.f32.mxu1 %vm2607_vm0, %v2606_v1  ;;  %826 = vperm.xlu1 %2555, %v477_v11   ;;  %v455_v28 = vld [vmem:[%s2725_s15 + $0x38] sm:$0xff]  ;;  %v456_v31 = vld [vmem:[%s2725_s15 + $0x40] sm:$0xff]  ;;  %v457_v34 = vld [vmem:[%s2725_s15 + $0x48] sm:$0xff]  ;;  %s3503_s14 = smov (!%p3325_p6, %s426_s14), 35 }
  0x19   : > { %v458_v37 = vld [vmem:[%s2725_s15 + $0x50] sm:$0xff]  ;;  %v459_v39 = vld [vmem:[%s2725_s15 + $0x58] sm:$0xff]  ;;  %v460_v40 = vld [vmem:[%s2725_s15 + $0x60] sm:$0xff]  ;;  %2452 = vmatpush3.bf16.msra.mxu1 %v2449_v53  ;;  %s3343_s18 = sadd.s32 %s2510_s16, %s3503_s14 }
  0x1a   : > { %2324 = vmatmul.mubr.msk.f32.gmra.mrb[2].mxu0 %vm503_vm1, %v449_v8  ;;  %831 = vperm.xlu0 %2554, %v478_v14   ;;  %v461_v41 = vld [vmem:[%s2725_s15 + $0x68] sm:$0xff]  ;;  %v462_v42 = vld [vmem:[%s2725_s15 + $0x70] sm:$0xff]  ;;  %v463_v43 = vld [vmem:[%s2725_s15 + $0x78] sm:$0xff]  ;;  %s2179_s17 = sshll.u32 %s3343_s18, 3 }
  0x1b   : > { %2326 = vmatprep.mubr.msk.f32.mxu0 %vm2607_vm0, %v2606_v1  ;;  %2387 = vmatmul.mubr.msk.f32.gmra.mrb[2].mxu1 %vm503_vm1, %v470_v12  ;;  %v464_v44 = vld [vmem:[%s2725_s15 + $0x80] sm:$0xff]  ;;  %v465_v45 = vld [vmem:[%s2725_s15 + $0x88] sm:$0xff]  ;;  %v466_v46 = vld [vmem:[%s2725_s15 + $0x90] sm:$0xff]  ;;  %s3355_s28 = scalar_lea.vmem %s3479_s2, %s2179_s17  ;;  %s3409_s16 = scalar_lea.vmem %s3488_s11, %s2179_s17 }
  0x1c   : > { %836 = vperm.xlu1 %2555, %v479_v15   ;;  %v467_v47 = vld [vmem:[%s2725_s15 + $0x98] sm:$0xff]  ;;  %v468_v48 = vld [vmem:[%s2725_s15 + $0xa0] sm:$0xff] }
  0x1d   : > { %v2888_v14 = vld [vmem:[%s3486_s9] sm:$0xff] }
  0x1e   : > { %2327 = vmatmul.mubr.msk.f32.gmra.mrb[4].mxu0 %vm503_vm1, %v450_v13  ;;  %841 = vperm.xlu0 %2554, %v480_v17  }
  0x1f   : > { %2329 = vmatprep.mubr.msk.f32.mxu0 %vm2607_vm0, %v2606_v1  ;;  %2420 = vmatprep.subr.mxu1 %v2888_v14 }
  0x20   : > { %846 = vperm.xlu1 %2555, %v481_v18  }
  0x22   : > { %2330 = vmatmul.mubr.msk.f32.gmra.mrb[6].mxu0 %vm503_vm1, %v451_v16  ;;  %851 = vperm.xlu0 %2554, %v482_v20  }
  0x23   : > { %2332 = vmatprep.mubr.msk.f32.mxu0 %vm2607_vm0, %v2606_v1 }
  0x24   : > { %856 = vperm.xlu1 %2555, %v483_v21  }
  0x26   : > { %2333 = vmatmul.mubr.msk.f32.gmra.mrb[8].mxu0 %vm503_vm1, %v452_v19  ;;  %861 = vperm.xlu0 %2554, %v484_v23  }
  0x27   : > { %2335 = vmatprep.mubr.msk.f32.mxu0 %vm2607_vm0, %v2606_v1 }
  0x28   : > { %866 = vperm.xlu1 %2555, %v485_v24  }
  0x2a   : > { %2336 = vmatmul.mubr.msk.f32.gmra.mrb[10].mxu0 %vm503_vm1, %v453_v22  ;;  %871 = vperm.xlu0 %2554, %v486_v26  }
  0x2b   : > { %2338 = vmatprep.mubr.msk.f32.mxu0 %vm2607_vm0, %v2606_v1 }
  0x2c   : > { %876 = vperm.xlu1 %2555, %v487_v27  }
  0x2e   : > { %2339 = vmatmul.mubr.msk.f32.gmra.mrb[12].mxu0 %vm503_vm1, %v454_v25  ;;  %881 = vperm.xlu0 %2554, %v488_v29  }
  0x2f   : > { %2341 = vmatprep.mubr.msk.f32.mxu0 %vm2607_vm0, %v2606_v1 }
  0x30   : > { %886 = vperm.xlu1 %2555, %v489_v30  }
  0x32   : > { %2342 = vmatmul.mubr.msk.f32.gmra.mrb[14].mxu0 %vm503_vm1, %v455_v28  ;;  %891 = vperm.xlu0 %2554, %v490_v32  }
  0x33   : > { %2344 = vmatprep.mubr.msk.f32.mxu0 %vm2607_vm0, %v2606_v1 }
  0x34   : > { %896 = vperm.xlu1 %2555, %v491_v33  }
  0x36   : > { %2345 = vmatmul.mubr.msk.f32.gmra.mrb[16].mxu0 %vm503_vm1, %v456_v31  ;;  %901 = vperm.xlu0 %2554, %v492_v35  }
  0x37   : > { %2347 = vmatprep.mubr.msk.f32.mxu0 %vm2607_vm0, %v2606_v1 }
  0x38   : > { %906 = vperm.xlu1 %2555, %v493_v36  }
  0x3a   : > { %2348 = vmatmul.mubr.msk.f32.gmra.mrb[18].mxu0 %vm503_vm1, %v457_v34  ;;  %911 = vperm.xlu0 %2554, %v494_v38  }
  0x3b   : > { %2350 = vmatprep.mubr.msk.f32.mxu0 %vm2607_vm0, %v2606_v1 }
  0x3e   : > { %2351 = vmatmul.mubr.msk.f32.gmra.mrb[20].mxu0 %vm503_vm1, %v458_v37 }
  0x3f   : > { %2353 = vmatprep.mubr.msk.f32.mxu0 %vm2607_vm0, %v2606_v1 }
  0x42   : > { %2354 = vmatmul.mubr.msk.f32.gmra.mrb[22].mxu0 %vm503_vm1, %v459_v39 }
  0x43   : > { %2356 = vmatprep.mubr.msk.f32.mxu0 %vm2607_vm0, %v2606_v1 }
  0x46   : > { %2357 = vmatmul.mubr.msk.f32.gmra.mrb[24].mxu0 %vm503_vm1, %v460_v40 }
  0x47   : > { %2359 = vmatprep.mubr.msk.f32.mxu0 %vm2607_vm0, %v2606_v1 }
  0x4a   : > { %2360 = vmatmul.mubr.msk.f32.gmra.mrb[26].mxu0 %vm503_vm1, %v461_v41 }
  0x4b   : > { %2362 = vmatprep.mubr.msk.f32.mxu0 %vm2607_vm0, %v2606_v1 }
  0x4e   : > { %2363 = vmatmul.mubr.msk.f32.gmra.mrb[28].mxu0 %vm503_vm1, %v462_v42 }
  0x4f   : > { %2365 = vmatprep.mubr.msk.f32.mxu0 %vm2607_vm0, %v2606_v1 }
  0x52   : > { %2366 = vmatmul.mubr.msk.f32.gmra.mrb[30].mxu0 %vm503_vm1, %v463_v43 }
  0x53   : > { %2368 = vmatprep.mubr.msk.f32.mxu0 %vm2607_vm0, %v2606_v1 }
  0x56   : > { %2369 = vmatmul.mubr.msk.f32.gmra.mrb[32].mxu0 %vm503_vm1, %v464_v44 }
  0x57   : > { %2371 = vmatprep.mubr.msk.f32.mxu0 %vm2607_vm0, %v2606_v1 }
  0x5a   : > { %2372 = vmatmul.mubr.msk.f32.gmra.mrb[34].mxu0 %vm503_vm1, %v465_v45 }
  0x5b   : > { %2374 = vmatprep.mubr.msk.f32.mxu0 %vm2607_vm0, %v2606_v1 }
  0x5e   : > { %2375 = vmatmul.mubr.msk.f32.gmra.mrb[36].mxu0 %vm503_vm1, %v466_v46 }
  0x5f   : > { %2377 = vmatprep.mubr.msk.f32.mxu0 %vm2607_vm0, %v2606_v1 }
  0x62   : > { %2378 = vmatmul.mubr.msk.f32.gmra.mrb[38].mxu0 %vm503_vm1, %v467_v47 }
  0x63   : > { %2380 = vmatprep.mubr.msk.f32.mxu0 %vm2607_vm0, %v2606_v1 }
  0x66   : > { %2381 = vmatmul.mubr.msk.f32.gmra.mrb[40].mxu0 %vm503_vm1, %v468_v48 }
  0x8d   : > { %v802_v49 = vpop.permute.xlu0 %801  ;;  %v2837_v50 = vpop.permute.xlu1 %811 }
  0x91   : > { %v807_v54 = vpop.permute.xlu0 %806  ;;  %v2845_v55 = vpop.permute.xlu1 %816 }
  0x95   : > { %v2847_v56 = vpop.permute.xlu0 %821 }
  0x97   : > { %v2849_v57 = vpop.permute.xlu1 %826 }
  0x99   : > { %v2851_v58 = vpop.permute.xlu0 %831 }
  0x9b   : > { %v2853_v59 = vpop.permute.xlu1 %836 }
  0x9d   : > { %v2855_v60 = vpop.permute.xlu0 %841 }
  0x9f   : > { %v2857_v61 = vpop.permute.xlu1 %846 }
  0xa1   : > { %v2859_v62 = vpop.permute.xlu0 %851 }
  0xa3   : > { %v2861_v63 = vpop.permute.xlu1 %856 }
  0xa5   : > { %v2863_v0 = vpop.permute.xlu0 %861 }
  0xa7   : > { %v2865_v1 = vpop.permute.xlu1 %866 }
  0xa9   : > { %v2867_v2 = vpop.permute.xlu0 %871 }
  0xab   : > { %v2869_v3 = vpop.permute.xlu1 %876 }
  0xad   : > { %v2871_v4 = vpop.permute.xlu0 %881 }
  0xaf   : > { %v2873_v5 = vpop.permute.xlu1 %886 }
  0xb1   : > { %v2880_v7 = vpop.permute.xlu0 %891 }
  0xb3   : > { %v2883_v11 = vpop.permute.xlu1 %896 }
  0xb5   : > { %v2893_v21 = vpop.permute.xlu0 %901 }
  0xb7   : > { %v907_v26 = vpop.permute.xlu1 %906 }
  0xb9   : > { %v912_v38 = vpop.permute.xlu0 %911 }
  0xe9   : > { %v639_v8 = vpop.f32.mrb[0].mxu0 }
  0xea   : > { %v640_v9 = vadd.f32 %v2878_v6, %v639_v8  ;;  %v2322_v10 = vpop.f32.mrb[1].mxu0  ;;  %v744_v13 = vpop.f32.mrb[0].mxu1 }
  0xeb   : > { %v745_v16 = vadd.f32 %v2878_v6, %v744_v13  ;;  %v2385_v17 = vpop.f32.mrb[1].mxu1 }
  0xec   : > { %v753_v12 = vmax.f32 %v640_v9, 0.0 }
  0xed   : > { %v644_v15 = vpop.f32.mrb[2].mxu0  ;;  %v774_v22 = vmax.f32 %v745_v16, 0.0 }
  0xee   : > { %v776_v18 = vmin.f32 %v753_v12, 6.0  ;;  %v645_v19 = vadd.f32 %v2878_v6, %v644_v15  ;;  %v2325_v20 = vpop.f32.mrb[3].mxu0  ;;  %v749_v25 = vpop.f32.mrb[2].mxu1 }
  0xef   : > { %v797_v28 = vmin.f32 %v774_v22, 6.0  ;;  %v750_v29 = vadd.f32 %v2878_v6, %v749_v25  ;;  %v2388_v30 = vpop.f32.mrb[3].mxu1 }
  0xf0   : > { %v914_v23 = vmul.f32 %v802_v49, %v776_v18  ;;  %v754_v24 = vmax.f32 %v645_v19, 0.0  ;;  %v2923_v18 = vld [vmem:[%s3482_s5 + $0x2] ss:$0 sm:$0xff]  ;;  %v2932_v30 = vld [vmem:[%s3482_s5 + $0x3] ss:$0 sm:$0xff] }
  0xf1   : > { %v649_v27 = vpop.f32.mrb[4].mxu0  ;;  %v775_v34 = vmax.f32 %v750_v29, 0.0  ;;  %v935_v35 = vmul.f32 %v907_v26, %v797_v28 }
  0xf2   : > { %938 = vst.msk [vmem:[#allocation2] sm:$0xff] %vm937_vm2, %v914_v23  ;;  %v777_v31 = vmin.f32 %v754_v24, 6.0  ;;  %v650_v32 = vadd.f32 %v2878_v6, %v649_v27  ;;  %v2328_v33 = vpop.f32.mrb[5].mxu0 }
  0xf3   : > { %v798_v40 = vmin.f32 %v775_v34, 6.0  ;;  %959 = vst.msk [vmem:[#allocation2 + $0xa8] sm:$0xff] %vm937_vm2, %v935_v35 }
  0xf4   : > { %v915_v36 = vmul.f32 %v807_v54, %v777_v31  ;;  %v755_v37 = vmax.f32 %v650_v32, 0.0 }
  0xf5   : > { %v654_v39 = vpop.f32.mrb[6].mxu0  ;;  %v936_v44 = vmul.f32 %v912_v38, %v798_v40 }
  0xf6   : > { %939 = vst.msk [vmem:[#allocation2 + $0x8] sm:$0xff] %vm937_vm2, %v915_v36  ;;  %v778_v41 = vmin.f32 %v755_v37, 6.0  ;;  %v655_v42 = vadd.f32 %v2878_v6, %v654_v39  ;;  %v2331_v43 = vpop.f32.mrb[7].mxu0 }
  0xf7   : > { %961 = vst.msk [vmem:[#allocation2 + $0xb0] sm:$0xf] %vm960_vm3, %v936_v44 }
  0xf8   : > { %v916_v45 = vmul.f32 %v2837_v50, %v778_v41  ;;  %v756_v46 = vmax.f32 %v655_v42, 0.0  ;;  %v2913_v50 = vld [vmem:[%s3482_s5] ss:$0 sm:$0xff]  ;;  %v2939_v42 = vld [vmem:[%s3482_s5 + $0x4] ss:$0 sm:$0xff] }
  0xf9   : > { %v659_v47 = vpop.f32.mrb[8].mxu0  ;;  %v973_v8 = vld [vmem:[#allocation2] sm:$0xff] }
  0xfa   : > { %940 = vst.msk [vmem:[#allocation2 + $0x10] sm:$0xff] %vm937_vm2, %v916_v45  ;;  %v779_v48 = vmin.f32 %v756_v46, 6.0  ;;  %v660_v49 = vadd.f32 %v2878_v6, %v659_v47  ;;  %v2334_v51 = vpop.f32.mrb[9].mxu0  ;;  %v995_v17 = vmul.f32 %v2913_v50, %v973_v8 }
  0xfc   : > { %v917_v53 = vmul.f32 %v2845_v55, %v779_v48  ;;  %v757_v54 = vmax.f32 %v660_v49, 0.0 }
  0xfd   : > { %v1013_v9 = vld [vmem:[#allocation2 + $0x1] sm:$0xff]  ;;  %v664_v10 = vpop.f32.mrb[10].mxu0 }
  0xfe   : > { %v1035_v12 = vmul.f32 %v2907_v52, %v1013_v9  ;;  %941 = vst.msk [vmem:[#allocation2 + $0x18] sm:$0xff] %vm937_vm2, %v917_v53  ;;  %v780_v13 = vmin.f32 %v757_v54, 6.0  ;;  %v2337_v15 = vpop.f32.mrb[11].mxu0  ;;  %v665_v16 = vadd.f32 %v2878_v6, %v664_v10  ;;  %v1071_v19 = vld [vmem:[#allocation2 + $0x2] sm:$0xff] }
  0xff   : > { %v974_v24 = vld [vmem:[#allocation2 + $0x8] sm:$0xff] }
 0x100   : > { %v918_v55 = vmul.f32 %v2847_v56, %v780_v13  ;;  %v758_v22 = vmax.f32 %v665_v16, 0.0  ;;  %v1053_v25 = vadd.f32 %v1035_v12, %v995_v17  ;;  %v1093_v56 = vmul.f32 %v2923_v18, %v1071_v19  ;;  %v2953_v16 = vld [vmem:[%s3482_s5 + $0x5] ss:$0 sm:$0xff] }
 0x101   : > { %v1014_v20 = vld [vmem:[#allocation2 + $0x9] sm:$0xff]  ;;  %v669_v23 = vpop.f32.mrb[12].mxu0  ;;  %v996_v31 = vmul.f32 %v2913_v50, %v974_v24 }
 0x102   : > { %942 = vst.msk [vmem:[#allocation2 + $0x20] sm:$0xff] %vm937_vm2, %v918_v55  ;;  %v2340_v26 = vpop.f32.mrb[13].mxu0  ;;  %v1036_v27 = vmul.f32 %v2907_v52, %v1014_v20  ;;  %v781_v28 = vmin.f32 %v758_v22, 6.0  ;;  %v670_v29 = vadd.f32 %v2878_v6, %v669_v23  ;;  %v1111_v37 = vadd.f32 %v1093_v56, %v1053_v25  ;;  %v975_v38 = vld [vmem:[#allocation2 + $0x10] sm:$0xff] }
 0x103   : > { %v1072_v39 = vld [vmem:[#allocation2 + $0xa] sm:$0xff]  ;;  %v997_v48 = vmul.f32 %v2913_v50, %v975_v38 }
 0x104   : > { %v919_v34 = vmul.f32 %v2849_v57, %v781_v28  ;;  %v759_v35 = vmax.f32 %v670_v29, 0.0  ;;  %v1054_v41 = vadd.f32 %v1036_v27, %v996_v31  ;;  %v1094_v49 = vmul.f32 %v2923_v18, %v1072_v39  ;;  %v2963_v29 = vld [vmem:[%s3482_s5 + $0x6] ss:$0 sm:$0xff] }
 0x105   : > { %v1015_v32 = vld [vmem:[#allocation2 + $0x11] sm:$0xff]  ;;  %v674_v36 = vpop.f32.mrb[14].mxu0 }
 0x106   : > { %v1073_v33 = vld [vmem:[#allocation2 + $0x12] sm:$0xff]  ;;  %v2343_v40 = vpop.f32.mrb[15].mxu0  ;;  %v1037_v43 = vmul.f32 %v2907_v52, %v1015_v32  ;;  %943 = vst.msk [vmem:[#allocation2 + $0x28] sm:$0xff] %vm937_vm2, %v919_v34  ;;  %v782_v57 = vmin.f32 %v759_v35, 6.0  ;;  %v675_v47 = vadd.f32 %v2878_v6, %v674_v36  ;;  %v1112_v15 = vadd.f32 %v1094_v49, %v1054_v41 }
 0x107   : > { %v1135_v44 = vmul.f32 %v2932_v30, %v1073_v33  ;;  %v1171_v45 = vld [vmem:[#allocation2 + $0x13] sm:$0xff]  ;;  %v1095_v26 = vmul.f32 %v2923_v18, %v1073_v33 }
 0x108   : > { %v976_v46 = vld [vmem:[#allocation2 + $0x18] sm:$0xff]  ;;  %v920_v8 = vmul.f32 %v2851_v58, %v782_v57  ;;  %v1193_v10 = vmul.f32 %v2939_v42, %v1171_v45  ;;  %v1055_v55 = vadd.f32 %v1037_v43, %v997_v48  ;;  %v760_v24 = vmax.f32 %v675_v47, 0.0  ;;  %v2972_v43 = vld [vmem:[%s3482_s5 + $0x7] ss:$0 sm:$0xff] }
 0x109   : > { %v1153_v51 = vadd.f32 %v1135_v44, %v1111_v37  ;;  %v1016_v53 = vld [vmem:[#allocation2 + $0x19] sm:$0xff]  ;;  %v679_v9 = vpop.f32.mrb[16].mxu0  ;;  %v998_v17 = vmul.f32 %v2913_v50, %v976_v46 }
 0x10a   : > { %v1074_v54 = vld [vmem:[#allocation2 + $0x1a] sm:$0xff]  ;;  %v1038_v12 = vmul.f32 %v2907_v52, %v1016_v53  ;;  %v2346_v13 = vpop.f32.mrb[17].mxu0  ;;  %944 = vst.msk [vmem:[#allocation2 + $0x30] sm:$0xff] %vm937_vm2, %v920_v8  ;;  %v680_v25 = vadd.f32 %v2878_v6, %v679_v9  ;;  %v783_v36 = vmin.f32 %v760_v24, 6.0  ;;  %v1113_v39 = vadd.f32 %v1095_v26, %v1055_v55  ;;  %v2981_v9 = vld [vmem:[%s3482_s5 + $0x8] ss:$0 sm:$0xff] }
 0x10b   : > { %v1229_v19 = vld [vmem:[#allocation2 + $0x14] sm:$0xff]  ;;  %v1136_v20 = vmul.f32 %v2932_v30, %v1074_v54  ;;  %v1211_v58 = vadd.f32 %v1193_v10, %v1153_v51  ;;  %v977_v22 = vld [vmem:[#allocation2 + $0x20] sm:$0xff]  ;;  %v1096_v33 = vmul.f32 %v2923_v18, %v1074_v54 }
 0x10c   : > { %v1172_v23 = vld [vmem:[#allocation2 + $0x1b] sm:$0xff]  ;;  %v1056_v27 = vadd.f32 %v1038_v12, %v998_v17  ;;  %v1251_v31 = vmul.f32 %v2953_v16, %v1229_v19  ;;  %v761_v37 = vmax.f32 %v680_v25, 0.0  ;;  %v999_v40 = vmul.f32 %v2913_v50, %v977_v22 }
 0x10d   : > { %v1154_v28 = vadd.f32 %v1136_v20, %v1112_v15  ;;  %v684_v56 = vpop.f32.mrb[18].mxu0  ;;  %v1230_v32 = vld [vmem:[#allocation2 + $0x1c] sm:$0xff]  ;;  %v1194_v41 = vmul.f32 %v2939_v42, %v1172_v23  ;;  %v1231_v44 = vld [vmem:[#allocation2 + $0x24] sm:$0xff]  ;;  %v921_v20 = vmul.f32 %v2853_v59, %v783_v36 }
 0x10e   : > { %v1017_v34 = vld [vmem:[#allocation2 + $0x21] sm:$0xff]  ;;  %v2349_v38 = vpop.f32.mrb[19].mxu0  ;;  %v1269_v45 = vadd.f32 %v1251_v31, %v1211_v58  ;;  %v1293_v49 = vmul.f32 %v2963_v29, %v1231_v44  ;;  %v1114_v53 = vadd.f32 %v1096_v33, %v1056_v27  ;;  %v1252_v8 = vmul.f32 %v2953_v16, %v1230_v32 }
 0x10f   : > { %v1075_v35 = vld [vmem:[#allocation2 + $0x22] sm:$0xff]  ;;  %v1039_v46 = vmul.f32 %v2907_v52, %v1017_v34  ;;  %v1212_v54 = vadd.f32 %v1194_v41, %v1154_v28  ;;  %v685_v10 = vadd.f32 %v2878_v6, %v684_v56  ;;  %v784_v58 = vmin.f32 %v761_v37, 6.0  ;;  %945 = vst.msk [vmem:[#allocation2 + $0x38] sm:$0xff] %vm937_vm2, %v921_v20 }
 0x110   : > { %v978_v57 = vld [vmem:[#allocation2 + $0x28] sm:$0xff]  ;;  %v1137_v47 = vmul.f32 %v2932_v30, %v1075_v35  ;;  %v1311_v15 = vadd.f32 %v1293_v49, %v1269_v45  ;;  %v1097_v24 = vmul.f32 %v2923_v18, %v1075_v35  ;;  %v1253_v31 = vmul.f32 %v2953_v16, %v1231_v44 }
 0x111   : > { %v1173_v48 = vld [vmem:[#allocation2 + $0x23] sm:$0xff]  ;;  %v689_v12 = vpop.f32.mrb[20].mxu0  ;;  %v1000_v23 = vmul.f32 %v2913_v50, %v978_v57  ;;  %v1174_v27 = vld [vmem:[#allocation2 + $0x2b] sm:$0xff]  ;;  %v1057_v56 = vadd.f32 %v1039_v46, %v999_v40  ;;  %v1270_v36 = vadd.f32 %v1252_v8, %v1212_v54  ;;  %v922_v44 = vmul.f32 %v2855_v60, %v784_v58  ;;  %v3004_v58 = vld [vmem:[%s3483_s6] ss:$0 sm:$0xff] }
 0x112   : > { %v1329_v51 = vld [vmem:[#allocation2 + $0x25] sm:$0xff]  ;;  %v1155_v13 = vadd.f32 %v1137_v47, %v1113_v39  ;;  %v2352_v22 = vpop.f32.mrb[21].mxu0  ;;  %v1195_v25 = vmul.f32 %v2939_v42, %v1173_v48  ;;  %v1330_v59 = vld [vmem:[#allocation2 + $0x2d] sm:$0xff]  ;;  %v1196_v40 = vmul.f32 %v2939_v42, %v1174_v27  ;;  %v762_v49 = vmax.f32 %v685_v10, 0.0 }
 0x113   : > { %v1387_v17 = vld [vmem:[#allocation2 + $0x26] sm:$0xff]  ;;  %v1351_v26 = vmul.f32 %v2972_v43, %v1329_v51  ;;  %v979_v57 = vld [vmem:[#allocation2 + $0x30] sm:$0xff]  ;;  %v1352_v47 = vmul.f32 %v2972_v43, %v1330_v59  ;;  %v690_v51 = vadd.f32 %v2878_v6, %v689_v12  ;;  %v1115_v54 = vadd.f32 %v1097_v24, %v1057_v56  ;;  %946 = vst.msk [vmem:[#allocation2 + $0x40] sm:$0xff] %vm937_vm2, %v922_v44 }
 0x114   : > { %v1018_v55 = vld [vmem:[#allocation2 + $0x29] sm:$0xff]  ;;  %v1409_v35 = vmul.f32 %v2981_v9, %v1387_v17  ;;  %v1213_v33 = vadd.f32 %v1195_v25, %v1155_v13  ;;  %v785_v17 = vmin.f32 %v762_v49, 6.0  ;;  %v1001_v10 = vmul.f32 %v2913_v50, %v979_v57 }
 0x115   : > { %v1076_v19 = vld [vmem:[#allocation2 + $0x2a] sm:$0xff]  ;;  %v1040_v32 = vmul.f32 %v2907_v52, %v1018_v55  ;;  %v1369_v37 = vadd.f32 %v1351_v26, %v1311_v15  ;;  %v694_v39 = vpop.f32.mrb[22].mxu0  ;;  %v763_v55 = vmax.f32 %v690_v51, 0.0 }
 0x116   : > { %v1232_v28 = vld [vmem:[#allocation2 + $0x2c] sm:$0xff]  ;;  %v1138_v34 = vmul.f32 %v2932_v30, %v1076_v19  ;;  %v2355_v45 = vpop.f32.mrb[23].mxu0  ;;  %v1098_v12 = vmul.f32 %v2923_v18, %v1076_v19  ;;  %v1271_v25 = vadd.f32 %v1253_v31, %v1213_v33  ;;  %v980_v26 = vld [vmem:[#allocation2 + $0x38] sm:$0xff] }
 0x117   : > { %v1294_v38 = vmul.f32 %v2963_v29, %v1232_v28  ;;  %v1388_v48 = vld [vmem:[#allocation2 + $0x2e] sm:$0xff]  ;;  %v1058_v8 = vadd.f32 %v1040_v32, %v1000_v23  ;;  %v1427_v20 = vadd.f32 %v1409_v35, %v1369_v37  ;;  %v1254_v22 = vmul.f32 %v2953_v16, %v1232_v28 }
 0x118   : > { %v1156_v41 = vadd.f32 %v1138_v34, %v1114_v53  ;;  %v695_v53 = vadd.f32 %v2878_v6, %v694_v39  ;;  %v1410_v23 = vmul.f32 %v2981_v9, %v1388_v48  ;;  %v1019_v27 = vld [vmem:[#allocation2 + $0x31] sm:$0xff]  ;;  %v923_v32 = vmul.f32 %v2857_v61, %v785_v17 }
 0x119   : > { %v1312_v46 = vadd.f32 %v1294_v38, %v1270_v36  ;;  %v699_v60 = vpop.f32.mrb[24].mxu0  ;;  %v1077_v56 = vld [vmem:[#allocation2 + $0x32] sm:$0xff]  ;;  %v786_v34 = vmin.f32 %v763_v55, 6.0  ;;  %v1041_v37 = vmul.f32 %v2907_v52, %v1019_v27  ;;  %v1116_v39 = vadd.f32 %v1098_v12, %v1058_v8 }
 0x11a   : > { %v1214_v15 = vadd.f32 %v1196_v40, %v1156_v41  ;;  %v2358_v24 = vpop.f32.mrb[25].mxu0  ;;  %v764_v59 = vmax.f32 %v695_v53, 0.0  ;;  %v1139_v35 = vmul.f32 %v2932_v30, %v1077_v56  ;;  %v1175_v38 = vld [vmem:[#allocation2 + $0x33] sm:$0xff]  ;;  %v700_v28 = vadd.f32 %v2878_v6, %v699_v60  ;;  %947 = vst.msk [vmem:[#allocation2 + $0x48] sm:$0xff] %vm937_vm2, %v923_v32  ;;  %v981_v8 = vld [vmem:[#allocation2 + $0x40] sm:$0xff] }
 0x11b   : > { %v1370_v13 = vadd.f32 %v1352_v47, %v1312_v46  ;;  %v1233_v19 = vld [vmem:[#allocation2 + $0x34] sm:$0xff]  ;;  %v3017_v61 = vadd.f32 %v3004_v58, %v1427_v20  ;;  %v1002_v40 = vmul.f32 %v2913_v50, %v980_v26  ;;  %v1059_v44 = vadd.f32 %v1041_v37, %v1001_v10  ;;  %v1234_v10 = vld [vmem:[#allocation2 + $0x3c] sm:$0xff] }
 0x11c   : > { %v1272_v41 = vadd.f32 %v1254_v22, %v1214_v15  ;;  %v1295_v31 = vmul.f32 %v2963_v29, %v1233_v19  ;;  %v1157_v45 = vadd.f32 %v1139_v35, %v1115_v54  ;;  %v1197_v57 = vmul.f32 %v2939_v42, %v1175_v38  ;;  %v1331_v46 = vld [vmem:[#allocation2 + $0x35] sm:$0xff]  ;;  %v1390_v38 = vld [vmem:[#allocation2 + $0x3e] sm:$0xff] }
 0x11d   : > { %v1428_v36 = vadd.f32 %v1410_v23, %v1370_v13  ;;  %v704_v33 = vpop.f32.mrb[26].mxu0  ;;  %v1389_v47 = vld [vmem:[#allocation2 + $0x36] sm:$0xff]  ;;  %v1099_v49 = vmul.f32 %v2923_v18, %v1077_v56  ;;  %v924_v13 = vmul.f32 %v2859_v62, %v786_v34  ;;  %v787_v17 = vmin.f32 %v764_v59, 6.0 }
 0x11e   : > { %v2361_v48 = vpop.f32.mrb[27].mxu0  ;;  %v1313_v51 = vadd.f32 %v1295_v31, %v1271_v25  ;;  %v1020_v15 = vld [vmem:[#allocation2 + $0x39] sm:$0xff]  ;;  %v1215_v60 = vadd.f32 %v1197_v57, %v1157_v45  ;;  %v765_v12 = vmax.f32 %v700_v28, 0.0  ;;  %v1255_v22 = vmul.f32 %v2953_v16, %v1233_v19 }
 0x11f   : > { %v1078_v53 = vld [vmem:[#allocation2 + $0x3a] sm:$0xff]  ;;  %v3024_v55 = vadd.f32 %v3004_v58, %v1428_v36  ;;  %v1042_v54 = vmul.f32 %v2907_v52, %v1020_v15  ;;  %v1353_v23 = vmul.f32 %v2972_v43, %v1331_v46  ;;  %v3030_v24 = vmul.f32 %v2981_v9, %v1389_v47  ;;  %948 = vst.msk [vmem:[#allocation2 + $0x50] sm:$0xff] %vm937_vm2, %v924_v13 }
 0x120   : > { %v1176_v20 = vld [vmem:[#allocation2 + $0x3b] sm:$0xff]  ;;  %v1140_v25 = vmul.f32 %v2932_v30, %v1078_v53  ;;  %v1117_v26 = vadd.f32 %v1099_v49, %v1059_v44  ;;  %v1003_v27 = vmul.f32 %v2913_v50, %v981_v8  ;;  %v1296_v32 = vmul.f32 %v2963_v29, %v1234_v10 }
 0x121   : > { %v3034_v62 = vpop.f32.mrb[28].mxu0  ;;  %v1060_v56 = vadd.f32 %v1042_v54, %v1002_v40  ;;  %v1332_v34 = vld [vmem:[#allocation2 + $0x3d] sm:$0xff]  ;;  %v3038_v36 = vadd.f32 %v1353_v23, %v1313_v51  ;;  %v1198_v35 = vmul.f32 %v2939_v42, %v1176_v20  ;;  %v925_v19 = vmul.f32 %v2861_v63, %v787_v17  ;;  %v982_v44 = vld [vmem:[#allocation2 + $0x48] sm:$0xff] }
 0x122   : > { %v2364_v59 = vpop.f32.mrb[29].mxu0  ;;  %v1158_v37 = vadd.f32 %v1140_v25, %v1116_v39  ;;  %v1273_v28 = vadd.f32 %v1255_v22, %v1215_v60  ;;  %v1100_v31 = vmul.f32 %v2923_v18, %v1078_v53  ;;  %v1314_v45 = vadd.f32 %v1296_v32, %v1272_v41  ;;  %v1021_v57 = vld [vmem:[#allocation2 + $0x41] sm:$0xff] }
 0x123   : > { %v1079_v46 = vld [vmem:[#allocation2 + $0x42] sm:$0xff]  ;;  %v788_v40 = vmin.f32 %v765_v12, 6.0  ;;  %v1256_v48 = vmul.f32 %v2953_v16, %v1234_v10  ;;  %v1354_v49 = vmul.f32 %v2972_v43, %v1332_v34  ;;  %v1043_v39 = vmul.f32 %v2907_v52, %v1021_v57  ;;  %949 = vst.msk [vmem:[#allocation2 + $0x58] sm:$0xff] %vm937_vm2, %v925_v19 }
 0x124   : > { %v1216_v47 = vadd.f32 %v1198_v35, %v1158_v37  ;;  %v1177_v51 = vld [vmem:[#allocation2 + $0x43] sm:$0xff]  ;;  %v1118_v15 = vadd.f32 %v1100_v31, %v1060_v56  ;;  %v3050_v41 = vmul.f32 %v2981_v9, %v1390_v38  ;;  %v1141_v53 = vmul.f32 %v2932_v30, %v1079_v46 }
 0x125   : > { %v1235_v8 = vld [vmem:[#allocation2 + $0x44] sm:$0xff]  ;;  %v3047_v63 = vpop.f32.mrb[30].mxu0  ;;  %v3054_v13 = vadd.f32 %v2878_v6, %v704_v33  ;;  %v1004_v60 = vmul.f32 %v2913_v50, %v982_v44  ;;  %v1061_v54 = vadd.f32 %v1043_v39, %v1003_v27  ;;  %v1101_v20 = vmul.f32 %v2923_v18, %v1079_v46 }
 0x126   : > { %v2367_v17 = vpop.f32.mrb[31].mxu0  ;;  %v1297_v10 = vmul.f32 %v2963_v29, %v1235_v8  ;;  %v1333_v12 = vld [vmem:[#allocation2 + $0x45] sm:$0xff]  ;;  %v3059_v23 = vadd.f32 %v1354_v49, %v1314_v45  ;;  %v1159_v25 = vadd.f32 %v1141_v53, %v1117_v26  ;;  %v1199_v56 = vmul.f32 %v2939_v42, %v1177_v51  ;;  %v983_v27 = vld [vmem:[#allocation2 + $0x50] sm:$0xff] }
 0x127   : > { %v1391_v22 = vld [vmem:[#allocation2 + $0x46] sm:$0xff]  ;;  %v926_v33 = vmul.f32 %v2863_v0, %v788_v40  ;;  %v1274_v59 = vadd.f32 %v1256_v48, %v1216_v47  ;;  %v1257_v37 = vmul.f32 %v2953_v16, %v1235_v8  ;;  %v1355_v26 = vmul.f32 %v2972_v43, %v1333_v12  ;;  %v1392_v17 = vld [vmem:[#allocation2 + $0x4e] sm:$0xff] }
 0x128   : > { %v1022_v32 = vld [vmem:[#allocation2 + $0x49] sm:$0xff]  ;;  %v1315_v35 = vadd.f32 %v1297_v10, %v1273_v28  ;;  %v1217_v45 = vadd.f32 %v1199_v56, %v1159_v25  ;;  %v3069_v57 = vmul.f32 %v2981_v9, %v1391_v22  ;;  %v1119_v40 = vadd.f32 %v1101_v20, %v1061_v54 }
 0x129   : > { %v1080_v34 = vld [vmem:[#allocation2 + $0x4a] sm:$0xff]  ;;  %v1044_v38 = vmul.f32 %v2907_v52, %v1022_v32  ;;  %v3065_v44 = vpop.f32.mrb[32].mxu0  ;;  %950 = vst.msk [vmem:[#allocation2 + $0x60] sm:$0xff] %vm937_vm2, %v926_v33  ;;  %v766_v49 = vmax.f32 %v3054_v13, 0.0  ;;  %v1005_v39 = vmul.f32 %v2913_v50, %v983_v27 }
 0x12a   : > { %v1178_v19 = vld [vmem:[#allocation2 + $0x4b] sm:$0xff]  ;;  %v1142_v46 = vmul.f32 %v2932_v30, %v1080_v34  ;;  %v2370_v0 = vpop.f32.mrb[33].mxu0  ;;  %v1102_v51 = vmul.f32 %v2923_v18, %v1080_v34  ;;  %v3078_v22 = vadd.f32 %v1355_v26, %v1315_v35  ;;  %v984_v20 = vld [vmem:[#allocation2 + $0x58] sm:$0xff]  ;;  %v1275_v33 = vadd.f32 %v1257_v37, %v1217_v45 }
 0x12b   : > { %v1236_v31 = vld [vmem:[#allocation2 + $0x4c] sm:$0xff]  ;;  %v1062_v28 = vadd.f32 %v1044_v38, %v1004_v60  ;;  %v1200_v53 = vmul.f32 %v2939_v42, %v1178_v19  ;;  %v1237_v13 = vld [vmem:[#allocation2 + $0x54] sm:$0xff]  ;;  %v3087_v35 = vmul.f32 %v2981_v9, %v1392_v17  ;;  %v789_v17 = vmin.f32 %v766_v49, 6.0 }
 0x12c   : > { %v1298_v47 = vmul.f32 %v2963_v29, %v1236_v31  ;;  %v1334_v48 = vld [vmem:[#allocation2 + $0x4d] sm:$0xff]  ;;  %v1160_v8 = vadd.f32 %v1142_v46, %v1118_v15  ;;  %v1258_v54 = vmul.f32 %v2953_v16, %v1236_v31  ;;  %v1335_v26 = vld [vmem:[#allocation2 + $0x55] sm:$0xff]  ;;  %v1006_v46 = vmul.f32 %v2913_v50, %v984_v20 }
 0x12d   : > { %v1023_v10 = vld [vmem:[#allocation2 + $0x51] sm:$0xff]  ;;  %v3082_v32 = vpop.f32.mrb[34].mxu0  ;;  %v1356_v15 = vmul.f32 %v2972_v43, %v1334_v48  ;;  %v1120_v19 = vadd.f32 %v1102_v51, %v1062_v28  ;;  %v1259_v20 = vmul.f32 %v2953_v16, %v1237_v13 }
 0x12e   : > { %v1081_v12 = vld [vmem:[#allocation2 + $0x52] sm:$0xff]  ;;  %v1316_v60 = vadd.f32 %v1298_v47, %v1274_v59  ;;  %v1045_v25 = vmul.f32 %v2907_v52, %v1023_v10  ;;  %v1218_v34 = vadd.f32 %v1200_v53, %v1160_v8  ;;  %v2373_v38 = vpop.f32.mrb[35].mxu0  ;;  %v1299_v59 = vmul.f32 %v2963_v29, %v1237_v13 }
 0x12f   : > { %v1179_v56 = vld [vmem:[#allocation2 + $0x53] sm:$0xff]  ;;  %v1143_v27 = vmul.f32 %v2932_v30, %v1081_v12  ;;  %v1103_v0 = vmul.f32 %v2923_v18, %v1081_v12  ;;  %v1357_v12 = vmul.f32 %v2972_v43, %v1335_v26 }
 0x130   : > { %v1063_v31 = vadd.f32 %v1045_v25, %v1005_v39  ;;  %v1201_v37 = vmul.f32 %v2939_v42, %v1179_v56  ;;  %v1393_v45 = vld [vmem:[#allocation2 + $0x56] sm:$0xff]  ;;  %v3093_v48 = vadd.f32 %v1356_v15, %v1316_v60  ;;  %v1317_v8 = vadd.f32 %v1299_v59, %v1275_v33  ;;  %v985_v53 = vld [vmem:[#allocation2 + $0x60] sm:$0xff] }
 0x131   : > { %v1161_v47 = vadd.f32 %v1143_v27, %v1119_v40  ;;  %v1024_v28 = vld [vmem:[#allocation2 + $0x59] sm:$0xff]  ;;  %v710_v39 = vadd.f32 %v2878_v6, %v3034_v62  ;;  %v729_v10 = vpop.f32.mrb[36].mxu0  ;;  %v1276_v25 = vadd.f32 %v1258_v54, %v1218_v34  ;;  %v3103_v38 = vmul.f32 %v2981_v9, %v1393_v45 }
 0x132   : > { %v1082_v51 = vld [vmem:[#allocation2 + $0x5a] sm:$0xff]  ;;  %v1046_v40 = vmul.f32 %v2907_v52, %v1024_v28  ;;  %v2376_v60 = vpop.f32.mrb[37].mxu0  ;;  %v3100_v15 = vadd.f32 %v1103_v0, %v1063_v31  ;;  %v3106_v62 = vadd.f32 %v1357_v12, %v1317_v8  ;;  %v3109_v54 = vmul.f32 %v2913_v50, %v985_v53 }
 0x133   : > { %v1180_v56 = vld [vmem:[#allocation2 + $0x5b] sm:$0xff]  ;;  %v1219_v33 = vadd.f32 %v1201_v37, %v1161_v47  ;;  %v1144_v49 = vmul.f32 %v2932_v30, %v1082_v51  ;;  %v1104_v13 = vmul.f32 %v2923_v18, %v1082_v51  ;;  %v927_v0 = vmul.f32 %v2865_v1, %v789_v17 }
 0x134   : > { %v1238_v27 = vld [vmem:[#allocation2 + $0x5c] sm:$0xff]  ;;  %v1202_v31 = vmul.f32 %v2939_v42, %v1180_v56  ;;  %v767_v47 = vmax.f32 %v710_v39, 0.0  ;;  %v1064_v45 = vadd.f32 %v1046_v40, %v1006_v46  ;;  %v1469_v8 = vmax.f32 %v3017_v61, 0.0 }
 0x135   : > { %v1300_v34 = vmul.f32 %v2963_v29, %v1238_v27  ;;  %v1336_v59 = vld [vmem:[#allocation2 + $0x5d] sm:$0xff]  ;;  %v1162_v26 = vadd.f32 %v1144_v49, %v1120_v19  ;;  %v734_v37 = vpop.f32.mrb[38].mxu0  ;;  %v1260_v28 = vmul.f32 %v2953_v16, %v1238_v27  ;;  %v715_v53 = vadd.f32 %v2878_v6, %v3047_v63  ;;  %951 = vst.msk [vmem:[#allocation2 + $0x68] sm:$0xff] %vm937_vm2, %v927_v0 }
 0x136   : > { %v2379_v12 = vpop.f32.mrb[39].mxu0  ;;  %v1358_v51 = vmul.f32 %v2972_v43, %v1336_v59  ;;  %v790_v19 = vmin.f32 %v767_v47, 6.0  ;;  %v1470_v56 = vmax.f32 %v3024_v55, 0.0  ;;  %v720_v1 = vadd.f32 %v2878_v6, %v3065_v44  ;;  %v1394_v59 = vld [vmem:[#allocation2 + $0x5e] sm:$0xff] }
 0x137   : > { %v1318_v17 = vadd.f32 %v1300_v34, %v1276_v25  ;;  %v1487_v46 = vmin.f32 %v1469_v8, 6.0  ;;  %v768_v39 = vmax.f32 %v715_v53, 0.0  ;;  %v1429_v61 = vadd.f32 %v3030_v24, %v3038_v36 }
 0x138   : > { %v1220_v40 = vadd.f32 %v1202_v31, %v1162_v26  ;;  %v928_v63 = vmul.f32 %v2867_v2, %v790_v19  ;;  %v1488_v27 = vmin.f32 %v1470_v56, 6.0  ;;  %v769_v60 = vmax.f32 %v720_v1, 0.0 }
 0x139   : > { %v3127_v49 = vpop.f32.mrb[40].mxu0  ;;  %1505 = vst.msk [vmem:[#allocation3] sm:$0xff] %vm937_vm2, %v1487_v46  ;;  %v791_v55 = vmin.f32 %v768_v39, 6.0  ;;  %v1453_v0 = vadd.f32 %v3004_v58, %v1429_v61  ;;  %v725_v44 = vadd.f32 %v2878_v6, %v3082_v32  ;;  %v1430_v25 = vadd.f32 %v3050_v41, %v3059_v23 }
 0x13a   : > { %v2382_v24 = vpop.f32.mrb[41].mxu0  ;;  %952 = vst.msk [vmem:[#allocation2 + $0x70] sm:$0xff] %vm937_vm2, %v928_v63  ;;  %1506 = vst.msk [vmem:[#allocation3 + $0x8] sm:$0xff] %vm937_vm2, %v1488_v27  ;;  %v792_v2 = vmin.f32 %v769_v60, 6.0  ;;  %v730_v36 = vadd.f32 %v2878_v6, %v729_v10  ;;  %v1431_v34 = vadd.f32 %v3069_v57, %v3078_v22  ;;  %v3141_v26 = vadd.f32 %v2878_v6, %v734_v37 }
 0x13b   : > { %v929_v31 = vmul.f32 %v2869_v3, %v791_v55  ;;  %v1471_v32 = vmax.f32 %v1453_v0, 0.0  ;;  %v770_v47 = vmax.f32 %v725_v44, 0.0  ;;  %v1454_v41 = vadd.f32 %v3004_v58, %v1430_v25 }
 0x13c   : > { %v1277_v23 = vadd.f32 %v1259_v20, %v1219_v33  ;;  %v1122_v8 = vadd.f32 %v1104_v13, %v1064_v45  ;;  %v3146_v53 = vmul.f32 %v2981_v9, %v1394_v59  ;;  %v930_v12 = vmul.f32 %v2871_v4, %v792_v2  ;;  %v1025_v19 = vld [vmem:[#allocation2 + $0x61] sm:$0xff] }
 0x13d   : > { %v3149_v10 = vadd.f32 %v1358_v51, %v1318_v17  ;;  %v1083_v57 = vld [vmem:[#allocation2 + $0x62] sm:$0xff]  ;;  %953 = vst.msk [vmem:[#allocation2 + $0x78] sm:$0xff] %vm937_vm2, %v929_v31  ;;  %v1489_v6 = vmin.f32 %v1471_v32, 6.0  ;;  %v793_v22 = vmin.f32 %v770_v47, 6.0  ;;  %v1472_v3 = vmax.f32 %v1454_v41, 0.0 }
 0x13e   : > { %v1278_v37 = vadd.f32 %v1260_v28, %v1220_v40  ;;  %v986_v56 = vld [vmem:[#allocation2 + $0x68] sm:$0xff]  ;;  %v1047_v1 = vmul.f32 %v2907_v52, %v1025_v19  ;;  %v1145_v20 = vmul.f32 %v2932_v30, %v1083_v57  ;;  %954 = vst.msk [vmem:[#allocation2 + $0x80] sm:$0xff] %vm937_vm2, %v930_v12  ;;  %v771_v4 = vmax.f32 %v730_v36, 0.0 }
 0x13f   : > { %v1181_v33 = vld [vmem:[#allocation2 + $0x63] sm:$0xff]  ;;  %1507 = vst.msk [vmem:[#allocation3 + $0x10] sm:$0xff] %vm937_vm2, %v1489_v6  ;;  %v3158_v17 = vadd.f32 %v3004_v58, %v1431_v34  ;;  %v772_v28 = vmax.f32 %v3141_v26, 0.0  ;;  %v3163_v46 = vadd.f32 %v3087_v35, %v3093_v48  ;;  %v931_v60 = vmul.f32 %v2873_v5, %v793_v22 }
 0x140   : > { %v1239_v13 = vld [vmem:[#allocation2 + $0x64] sm:$0xff]  ;;  %v1065_v39 = vadd.f32 %v1047_v1, %v3109_v54  ;;  %v1163_v61 = vadd.f32 %v1145_v20, %v3100_v15  ;;  %v1203_v40 = vmul.f32 %v2939_v42, %v1181_v33  ;;  %v1008_v59 = vmul.f32 %v2913_v50, %v986_v56 }
 0x141   : > { %v1301_v45 = vmul.f32 %v2963_v29, %v1239_v13  ;;  %v1337_v51 = vld [vmem:[#allocation2 + $0x65] sm:$0xff]  ;;  %v1105_v55 = vmul.f32 %v2923_v18, %v1083_v57  ;;  %v987_v44 = vld [vmem:[#allocation2 + $0x70] sm:$0xff]  ;;  %v1490_v35 = vmin.f32 %v1472_v3, 6.0  ;;  %v1261_v15 = vmul.f32 %v2953_v16, %v1239_v13  ;;  %955 = vst.msk [vmem:[#allocation2 + $0x88] sm:$0xff] %vm937_vm2, %v931_v60 }
 0x142   : > { %v1395_v63 = vld [vmem:[#allocation2 + $0x66] sm:$0xff]  ;;  %v1221_v48 = vadd.f32 %v1203_v40, %v1163_v61  ;;  %v1359_v54 = vmul.f32 %v2972_v43, %v1337_v51  ;;  %v3181_v41 = vmin.f32 %v771_v4, 6.0  ;;  %v1009_v19 = vmul.f32 %v2913_v50, %v987_v44  ;;  %v1396_v22 = vld [vmem:[#allocation2 + $0x6e] sm:$0xff] }
 0x143   : > { %v1523_v27 = vld [vmem:[#allocation3] sm:$0xff]  ;;  %v1319_v0 = vadd.f32 %v1301_v45, %v1277_v23  ;;  %v1026_v25 = vld [vmem:[#allocation2 + $0x69] sm:$0xff]  ;;  %v3177_v34 = vmul.f32 %v2981_v9, %v1395_v63  ;;  %1508 = vst.msk [vmem:[#allocation3 + $0x18] sm:$0xff] %vm937_vm2, %v1490_v35  ;;  %v1473_v23 = vmax.f32 %v3158_v17, 0.0  ;;  %v1123_v12 = vadd.f32 %v1105_v55, %v1065_v39 }
 0x144   : > { %v1084_v24 = vld [vmem:[#allocation2 + $0x6a] sm:$0xff]  ;;  %2393 = vmatprep.mubr.msk.f32.mxu1 %vm937_vm2, %v1523_v27  ;;  %v1048_v2 = vmul.f32 %v2907_v52, %v1026_v25  ;;  %v1085_v56 = vld [vmem:[#allocation2 + $0x72] sm:$0xff]  ;;  %v1279_v51 = vadd.f32 %v1261_v15, %v1221_v48 }
 0x145   : > { %v1182_v36 = vld [vmem:[#allocation2 + $0x6b] sm:$0xff]  ;;  %v1146_v31 = vmul.f32 %v2932_v30, %v1084_v24  ;;  %v3187_v1 = vadd.f32 %v1359_v54, %v1319_v0  ;;  %v1106_v20 = vmul.f32 %v2923_v18, %v1084_v24  ;;  %v988_v4 = vld [vmem:[#allocation2 + $0x78] sm:$0xff]  ;;  %v1107_v15 = vmul.f32 %v2923_v18, %v1085_v56 }
 0x146   : > { %v1240_v5 = vld [vmem:[#allocation2 + $0x6c] sm:$0xff]  ;;  %v1066_v57 = vadd.f32 %v1048_v2, %v1008_v59  ;;  %v1204_v13 = vmul.f32 %v2939_v42, %v1182_v36  ;;  %v1241_v45 = vld [vmem:[#allocation2 + $0x74] sm:$0xff]  ;;  %v3196_v59 = vmul.f32 %v2981_v9, %v1396_v22 }
 0x147   : > { %v1338_v32 = vld [vmem:[#allocation2 + $0x6d] sm:$0xff]  ;;  %v1302_v6 = vmul.f32 %v2963_v29, %v1240_v5  ;;  %v1164_v33 = vadd.f32 %v1146_v31, %v1122_v8  ;;  %v1262_v39 = vmul.f32 %v2953_v16, %v1240_v5  ;;  %v1147_v8 = vmul.f32 %v2932_v30, %v1085_v56  ;;  %v1339_v55 = vld [vmem:[#allocation2 + $0x75] sm:$0xff]  ;;  %v989_v5 = vld [vmem:[#allocation2 + $0x80] sm:$0xff] }
 0x148   : > { %v1524_v47 = vld [vmem:[#allocation3 + $0x8] sm:$0xff]  ;;  %v1027_v3 = vld [vmem:[#allocation2 + $0x71] sm:$0xff]  ;;  %v1360_v60 = vmul.f32 %v2972_v43, %v1338_v32  ;;  %v1028_v0 = vld [vmem:[#allocation2 + $0x79] sm:$0xff]  ;;  %v1124_v44 = vadd.f32 %v1106_v20, %v1066_v57  ;;  %v1303_v24 = vmul.f32 %v2963_v29, %v1241_v45  ;;  %v1263_v36 = vmul.f32 %v2953_v16, %v1241_v45 }
 0x149   : > { %2394 = vmatmul.mubr.msk.f32.vlgmr.msra.gmra.mrb[4].mxu1 %vm937_vm2, %v1524_v47  ;;  %v1320_v61 = vadd.f32 %v1302_v6, %v1278_v37  ;;  %v1049_v40 = vmul.f32 %v2907_v52, %v1027_v3  ;;  %v1183_v63 = vld [vmem:[#allocation2 + $0x73] sm:$0xff]  ;;  %v1222_v27 = vadd.f32 %v1204_v13, %v1164_v33  ;;  %v1165_v54 = vadd.f32 %v1147_v8, %v1123_v12  ;;  %v1242_v31 = vld [vmem:[#allocation2 + $0x7c] sm:$0xff] }
 0x14a   : > { %2421 = vmatpush3.msra.mxu1 %v2888_v14  ;;  %v1010_v14 = vmul.f32 %v2913_v50, %v988_v4  ;;  %v1397_v37 = vld [vmem:[#allocation2 + $0x76] sm:$0xff]  ;;  %v1205_v2 = vmul.f32 %v2939_v42, %v1183_v63  ;;  %v1321_v47 = vadd.f32 %v1303_v24, %v1279_v51  ;;  %v1050_v57 = vmul.f32 %v2907_v52, %v1028_v0  ;;  %v1029_v33 = vld [vmem:[#allocation2 + $0x81] sm:$0xff] }
 0x14b   : > { %v1067_v25 = vadd.f32 %v1049_v40, %v1009_v19  ;;  %v1086_v35 = vld [vmem:[#allocation2 + $0x7a] sm:$0xff]  ;;  %v1525_v48 = vld [vmem:[#allocation3 + $0x10] sm:$0xff]  ;;  %v3205_v32 = vadd.f32 %v1360_v60, %v1320_v61  ;;  %v1361_v19 = vmul.f32 %v2972_v43, %v1339_v55  ;;  %v1280_v22 = vadd.f32 %v1262_v39, %v1222_v27  ;;  %v990_v63 = vld [vmem:[#allocation2 + $0x88] sm:$0xff] }
 0x14c   : > { %2396 = vmatprep.mubr.msk.f32.mxu1 %vm937_vm2, %v1525_v48  ;;  %v1184_v6 = vld [vmem:[#allocation2 + $0x7b] sm:$0xff]  ;;  %v1223_v3 = vadd.f32 %v1205_v2, %v1165_v54  ;;  %v1419_v12 = vmul.f32 %v2981_v9, %v1397_v37  ;;  %v1148_v56 = vmul.f32 %v2932_v30, %v1086_v35  ;;  %v1011_v45 = vmul.f32 %v2913_v50, %v989_v5  ;;  %v1243_v0 = vld [vmem:[#allocation2 + $0x84] sm:$0xff] }
 0x14d   : > { %v1340_v20 = vld [vmem:[#allocation2 + $0x7d] sm:$0xff]  ;;  %v1125_v4 = vadd.f32 %v1107_v15, %v1067_v25  ;;  %v1068_v61 = vadd.f32 %v1050_v57, %v1010_v14  ;;  %v1304_v51 = vmul.f32 %v2963_v29, %v1242_v31  ;;  %v1108_v39 = vmul.f32 %v2923_v18, %v1086_v35 }
 0x14e   : > { %v1526_v13 = vld [vmem:[#allocation3 + $0x18] sm:$0xff]  ;;  %v1087_v60 = vld [vmem:[#allocation2 + $0x82] sm:$0xff]  ;;  %v1166_v27 = vadd.f32 %v1148_v56, %v1124_v44  ;;  %v1206_v8 = vmul.f32 %v2939_v42, %v1184_v6  ;;  %v1264_v55 = vmul.f32 %v2953_v16, %v1242_v31  ;;  %v1379_v24 = vadd.f32 %v1361_v19, %v1321_v47 }
 0x14f   : > { %v1398_v40 = vld [vmem:[#allocation2 + $0x7e] sm:$0xff]  ;;  %2397 = vmatmul.mubr.msk.f32.gmra.mrb[6].mxu1 %vm937_vm2, %v1526_v13  ;;  %v1322_v25 = vadd.f32 %v1304_v51, %v1280_v22  ;;  %v1362_v37 = vmul.f32 %v2972_v43, %v1340_v20  ;;  %v1051_v14 = vmul.f32 %v2907_v52, %v1029_v33  ;;  %v1281_v15 = vadd.f32 %v1263_v36, %v1223_v3 }
 0x150   : > { %v1185_v48 = vld [vmem:[#allocation2 + $0x83] sm:$0xff]  ;;  %v1420_v54 = vmul.f32 %v2981_v9, %v1398_v40  ;;  %v3221_v2 = vmul.f32 %v2913_v50, %v990_v63  ;;  %v1149_v44 = vmul.f32 %v2932_v30, %v1087_v60  ;;  %v3224_v35 = vadd.f32 %v1108_v39, %v1068_v61  ;;  %v2556_v33 = vld [vmem:[%s3481_s4] ss:$0 sm:$0xff] }
 0x151   : > { %v1224_v5 = vadd.f32 %v1206_v8, %v1166_v27  ;;  %v1109_v31 = vmul.f32 %v2923_v18, %v1087_v60  ;;  %v1305_v47 = vmul.f32 %v2963_v29, %v1243_v0  ;;  %v1207_v57 = vmul.f32 %v2939_v42, %v1185_v48  ;;  %v1341_v36 = vld [vmem:[#allocation2 + $0x85] sm:$0xff] }
 0x152   : > { %v1167_v19 = vadd.f32 %v1149_v44, %v1125_v4  ;;  %v1265_v52 = vmul.f32 %v2953_v16, %v1243_v0  ;;  %v932_v6 = vmul.f32 %v2880_v7, %v3181_v41  ;;  %v1380_v50 = vadd.f32 %v1362_v37, %v1322_v25 }
 0x153   : > { %v1069_v22 = vadd.f32 %v1051_v14, %v1011_v45  ;;  %v1491_v3 = vmin.f32 %v1473_v23, 6.0  ;;  %v795_v56 = vmin.f32 %v772_v28, 6.0  ;;  %v1323_v18 = vadd.f32 %v1305_v47, %v1281_v15 }
 0x154   : > { %956 = vst.msk [vmem:[#allocation2 + $0x90] sm:$0xff] %vm937_vm2, %v932_v6  ;;  %v1456_v20 = vadd.f32 %v3004_v58, %v3163_v46  ;;  %v740_v7 = vadd.f32 %v2556_v33, %v3127_v49  ;;  %v1433_v41 = vadd.f32 %v3103_v38, %v3106_v62  ;;  %v1363_v17 = vmul.f32 %v2972_v43, %v1341_v36 }
 0x155   : > { %1509 = vst.msk [vmem:[#allocation3 + $0x20] sm:$0xff] %vm937_vm2, %v1491_v3  ;;  %v933_v26 = vmul.f32 %v2883_v11, %v795_v56  ;;  %v1434_v28 = vadd.f32 %v3146_v53, %v3149_v10  ;;  %v1435_v46 = vadd.f32 %v3177_v34, %v3187_v1  ;;  %v1225_v23 = vadd.f32 %v1207_v57, %v1167_v19  ;;  %v1399_v53 = vld [vmem:[#allocation2 + $0x86] sm:$0xff] }
 0x156   : > { %v1474_v13 = vmax.f32 %v1456_v20, 0.0  ;;  %v773_v4 = vmax.f32 %v740_v7, 0.0  ;;  %v1457_v49 = vadd.f32 %v3004_v58, %v1433_v41  ;;  %v1436_v11 = vadd.f32 %v3196_v59, %v3205_v32 }
 0x157   : > { %957 = vst.msk [vmem:[#allocation2 + $0x98] sm:$0xff] %vm937_vm2, %v933_v26  ;;  %v1458_v38 = vadd.f32 %v3004_v58, %v1434_v28  ;;  %v1459_v62 = vadd.f32 %v3004_v58, %v1435_v46  ;;  %v1437_v45 = vadd.f32 %v1419_v12, %v1379_v24  ;;  %v1381_v61 = vadd.f32 %v1363_v17, %v1323_v18  ;;  %v2558_v18 = vld [vmem:[%s3482_s5 + $0x2] ss:$0 sm:$0xff] }
 0x158   : > { %v1492_v10 = vmin.f32 %v1474_v13, 6.0  ;;  %v796_v51 = vmin.f32 %v773_v4, 6.0  ;;  %v1475_v34 = vmax.f32 %v1457_v49, 0.0  ;;  %v1460_v63 = vadd.f32 %v3004_v58, %v1436_v11  ;;  %v2560_v49 = vld [vmem:[%s3482_s5 + $0x4] ss:$0 sm:$0xff] }
 0x159   : > { %v1476_v1 = vmax.f32 %v1458_v38, 0.0  ;;  %v1477_v40 = vmax.f32 %v1459_v62, 0.0  ;;  %v1438_v60 = vadd.f32 %v1420_v54, %v1380_v50  ;;  %v1282_v39 = vadd.f32 %v1264_v55, %v1224_v5  ;;  %v2557_v55 = vld [vmem:[%s3482_s5 + $0x1] ss:$0 sm:$0xff] }
 0x15a   : > { %1510 = vst.msk [vmem:[#allocation3 + $0x28] sm:$0xff] %vm937_vm2, %v1492_v10  ;;  %v934_v27 = vmul.f32 %v2893_v21, %v796_v51  ;;  %v1493_v8 = vmin.f32 %v1475_v34, 6.0  ;;  %v1461_v0 = vadd.f32 %v3004_v58, %v1437_v45  ;;  %v1421_v59 = vmul.f32 %v2981_v9, %v1399_v53 }
 0x15b   : > { %v1030_v32 = vld [vmem:[#allocation2 + $0x89] sm:$0xff]  ;;  %v1494_v25 = vmin.f32 %v1476_v1, 6.0  ;;  %v1495_v37 = vmin.f32 %v1477_v40, 6.0  ;;  %v1478_v14 = vmax.f32 %v1460_v63, 0.0  ;;  %v1127_v48 = vadd.f32 %v1109_v31, %v1069_v22 }
 0x15c   : > { %v1088_v12 = vld [vmem:[#allocation2 + $0x8a] sm:$0xff]  ;;  %v1283_v15 = vadd.f32 %v1265_v52, %v1225_v23  ;;  %v1052_v54 = vmul.f32 %v2557_v55, %v1030_v32  ;;  %958 = vst.msk [vmem:[#allocation2 + $0xa0] sm:$0xff] %vm937_vm2, %v934_v27  ;;  %1511 = vst.msk [vmem:[#allocation3 + $0x30] sm:$0xff] %vm937_vm2, %v1493_v8  ;;  %v1527_v31 = vld [vmem:[#allocation3 + $0x20] sm:$0xff]  ;;  %v3274_v52 = vadd.f32 %v3004_v58, %v1438_v60  ;;  %v1479_v56 = vmax.f32 %v1461_v0, 0.0 }
 0x15d   : > { %v1186_v24 = vld [vmem:[#allocation2 + $0x8b] sm:$0xff]  ;;  %v1150_v21 = vmul.f32 %v2932_v30, %v1088_v12  ;;  %1512 = vst.msk [vmem:[#allocation3 + $0x38] sm:$0xff] %vm937_vm2, %v1494_v25  ;;  %1513 = vst.msk [vmem:[#allocation3 + $0x40] sm:$0xff] %vm937_vm2, %v1495_v37  ;;  %v1439_v30 = vadd.f32 %v1421_v59, %v1381_v61  ;;  %2399 = vmatprep.mubr.msk.f32.mxu1 %vm937_vm2, %v1527_v31  ;;  %v1496_v3 = vmin.f32 %v1478_v14, 6.0 }
 0x15e   : > { %v1244_v44 = vld [vmem:[#allocation2 + $0x8c] sm:$0xff]  ;;  %v1208_v47 = vmul.f32 %v2939_v42, %v1186_v24  ;;  %v1070_v36 = vadd.f32 %v1052_v54, %v3221_v2  ;;  %v1245_v22 = vld [vmem:[#allocation2 + $0x94] sm:$0xff]  ;;  %v1110_v20 = vmul.f32 %v2558_v18, %v1088_v12  ;;  %v2559_v2 = vld [vmem:[%s3482_s5 + $0x3] ss:$0 sm:$0xff]  ;;  %v1497_v11 = vmin.f32 %v1479_v56, 6.0 }
 0x15f   : > { %v1342_v5 = vld [vmem:[#allocation2 + $0x8d] sm:$0xff]  ;;  %v1306_v19 = vmul.f32 %v2963_v29, %v1244_v44  ;;  %v1168_v6 = vadd.f32 %v1150_v21, %v3224_v35  ;;  %v1343_v41 = vld [vmem:[#allocation2 + $0x95] sm:$0xff]  ;;  %v1266_v26 = vmul.f32 %v2953_v16, %v1244_v44  ;;  %v1307_v46 = vmul.f32 %v2963_v29, %v1245_v22  ;;  %1514 = vst.msk [vmem:[#allocation3 + $0x48] sm:$0xff] %vm937_vm2, %v1496_v3  ;;  %v2561_v16 = vld [vmem:[%s3482_s5 + $0x5] ss:$0 sm:$0xff] }
 0x160   : > { %v1400_v57 = vld [vmem:[#allocation2 + $0x8e] sm:$0xff]  ;;  %v1364_v7 = vmul.f32 %v2972_v43, %v1342_v5  ;;  %v1401_v23 = vld [vmem:[#allocation2 + $0x96] sm:$0xff]  ;;  %v1128_v45 = vadd.f32 %v1110_v20, %v1070_v36  ;;  %v1267_v61 = vmul.f32 %v2561_v16, %v1245_v22  ;;  %v1365_v29 = vmul.f32 %v2972_v43, %v1343_v41  ;;  %1515 = vst.msk [vmem:[#allocation3 + $0x50] sm:$0xff] %vm937_vm2, %v1497_v11  ;;  %v2563_v54 = vld [vmem:[%s3482_s5 + $0x7] ss:$0 sm:$0xff] }
 0x161   : > { %v1129_v50 = vld [vmem:[#allocation2 + $0x92] sm:$0xff]  ;;  %v1324_v33 = vadd.f32 %v1306_v19, %v1282_v39  ;;  %v1226_v17 = vadd.f32 %v1208_v47, %v1168_v6  ;;  %v1422_v28 = vmul.f32 %v2981_v9, %v1400_v57  ;;  %v1528_v62 = vld [vmem:[#allocation3 + $0x28] sm:$0xff]  ;;  %v1325_v53 = vadd.f32 %v1307_v46, %v1283_v15 }
 0x162   : > { %v1187_v42 = vld [vmem:[#allocation2 + $0x93] sm:$0xff]  ;;  %v1151_v35 = vmul.f32 %v2559_v2, %v1129_v50  ;;  %2400 = vmatmul.mubr.msk.f32.gmra.mrb[8].mxu1 %vm937_vm2, %v1528_v62  ;;  %v1423_v51 = vmul.f32 %v2981_v9, %v1401_v23  ;;  %v1480_v63 = vmax.f32 %v3274_v52, 0.0  ;;  %v1463_v60 = vadd.f32 %v3004_v58, %v1439_v30  ;;  %v2562_v9 = vld [vmem:[%s3482_s5 + $0x6] ss:$0 sm:$0xff]  ;;  %v2564_v50 = vld [vmem:[%s3482_s5 + $0x8] ss:$0 sm:$0xff] }
 0x163   : > { %v1382_v13 = vadd.f32 %v1364_v7, %v1324_v33  ;;  %v1209_v38 = vmul.f32 %v2560_v49, %v1187_v42  ;;  %v1130_v34 = vld [vmem:[#allocation2 + $0x9a] sm:$0xff]  ;;  %v1284_v39 = vadd.f32 %v1266_v26, %v1226_v17  ;;  %v1383_v27 = vadd.f32 %v1365_v29, %v1325_v53  ;;  %v1287_v0 = vld [vmem:[#allocation2 + $0xa4] sm:$0xff]  ;;  %v1288_v57 = vld [vmem:[#allocation2 + $0xac] sm:$0xff] }
 0x164   : > { %v1169_v4 = vadd.f32 %v1151_v35, %v1127_v48  ;;  %v1188_v1 = vld [vmem:[#allocation2 + $0x9b] sm:$0xff]  ;;  %v1152_v8 = vmul.f32 %v2559_v2, %v1130_v34  ;;  %v1345_v43 = vld [vmem:[#allocation2 + $0xa5] sm:$0xff]  ;;  %v1309_v37 = vmul.f32 %v2562_v9, %v1287_v0  ;;  %v1529_v48 = vld [vmem:[#allocation3 + $0x30] sm:$0xff]  ;;  %v1498_v30 = vmin.f32 %v1480_v63, 6.0 }
 0x165   : > { %v1246_v40 = vld [vmem:[#allocation2 + $0x9c] sm:$0xff]  ;;  %v1440_v32 = vadd.f32 %v1422_v28, %v1382_v13  ;;  %v1210_v24 = vmul.f32 %v2560_v49, %v1188_v1  ;;  %v1367_v44 = vmul.f32 %v2563_v54, %v1345_v43  ;;  %v1403_v5 = vld [vmem:[#allocation2 + $0xa6] sm:$0xff]  ;;  %2402 = vmatprep.mubr.msk.f32.mxu1 %vm937_vm2, %v1529_v48  ;;  %v1481_v36 = vmax.f32 %v1463_v60, 0.0  ;;  %v1404_v46 = vld [vmem:[#allocation2 + $0xae] sm:$0xff] }
 0x166   : > { %v1227_v10 = vadd.f32 %v1209_v38, %v1169_v4  ;;  %v1344_v59 = vld [vmem:[#allocation2 + $0x9d] sm:$0xff]  ;;  %v1308_v25 = vmul.f32 %v2562_v9, %v1246_v40  ;;  %v1170_v15 = vadd.f32 %v1152_v8, %v1128_v45  ;;  %v1268_v55 = vmul.f32 %v2561_v16, %v1246_v40  ;;  %v1532_v22 = vld [vmem:[#allocation3 + $0x48] sm:$0xff]  ;;  %1516 = vst.msk [vmem:[#allocation3 + $0x58] sm:$0xff] %vm937_vm2, %v1498_v30  ;;  %v1765_v48 = vld [vmem:[%s3355_s28 + $0x30] sm:$0xff] }
 0x167   : > { %v1402_v14 = vld [vmem:[#allocation2 + $0x9e] sm:$0xff]  ;;  %v1366_v21 = vmul.f32 %v2563_v54, %v1344_v59  ;;  %v1464_v3 = vadd.f32 %v3004_v58, %v1440_v32  ;;  %v1441_v56 = vadd.f32 %v1423_v51, %v1383_v27  ;;  %v1346_v18 = vld [vmem:[#allocation2 + $0xad] sm:$0xff]  ;;  %v1425_v7 = vmul.f32 %v2564_v50, %v1403_v5 }
 0x168   : > { %v1285_v12 = vadd.f32 %v1267_v61, %v1227_v10  ;;  %v1530_v47 = vld [vmem:[#allocation3 + $0x38] sm:$0xff]  ;;  %v1531_v19 = vld [vmem:[#allocation3 + $0x40] sm:$0xff]  ;;  %v1326_v31 = vadd.f32 %v1308_v25, %v1284_v39  ;;  %v1228_v6 = vadd.f32 %v1210_v24, %v1170_v15  ;;  %v1424_v42 = vmul.f32 %v2564_v50, %v1402_v14  ;;  %v1533_v17 = vld [vmem:[#allocation3 + $0x50] sm:$0xff] }
 0x169   : > { %2403 = vmatmul.mubr.msk.f32.gmra.mrb[10].mxu1 %vm937_vm2, %v1530_v47  ;;  %v1499_v2 = vmin.f32 %v1481_v36, 6.0  ;;  %v1310_v35 = vmul.f32 %v2562_v9, %v1288_v57  ;;  %v1482_v26 = vmax.f32 %v1464_v3, 0.0  ;;  %v1465_v28 = vadd.f32 %v3004_v58, %v1441_v56  ;;  %v2565_v63 = vld [vmem:[%s3483_s6] ss:$0 sm:$0xff]  ;;  %v1760_v24 = vld [vmem:[%s3355_s28 + $0x8] sm:$0xff]  ;;  %v1761_v9 = vld [vmem:[%s3355_s28 + $0x10] sm:$0xff] }
 0x16a   : > { %v1327_v52 = vadd.f32 %v1309_v37, %v1285_v12  ;;  %2405 = vmatprep.mubr.msk.f32.mxu1 %vm937_vm2, %v1531_v19  ;;  %v1384_v20 = vadd.f32 %v1366_v21, %v1326_v31  ;;  %v1286_v41 = vadd.f32 %v1268_v55, %v1228_v6  ;;  %v1368_v4 = vmul.f32 %v2563_v54, %v1346_v18  ;;  %v1759_v32 = vld [vmem:[%s3355_s28] sm:$0xff]  ;;  %v1762_v25 = vld [vmem:[%s3355_s28 + $0x18] sm:$0xff]  ;;  %v1764_v14 = vld [vmem:[%s3355_s28 + $0x28] sm:$0xff] }
 0x16b   : > { %1517 = vst.msk [vmem:[#allocation3 + $0x60] sm:$0xff] %vm937_vm2, %v1499_v2  ;;  %v1500_v38 = vmin.f32 %v1482_v26, 6.0  ;;  %v1483_v62 = vmax.f32 %v1465_v28, 0.0  ;;  %v1426_v16 = vmul.f32 %v2564_v50, %v1404_v46  ;;  %v1763_v37 = vld [vmem:[%s3355_s28 + $0x20] sm:$0xff]  ;;  %v1766_v15 = vld [vmem:[%s3355_s28 + $0x38] sm:$0xff]  ;;  %v1768_v54 = vld [vmem:[%s3355_s28 + $0x48] sm:$0xff] }
 0x16c   : > { %v1385_v33 = vadd.f32 %v1367_v44, %v1327_v52  ;;  %v1442_v23 = vadd.f32 %v1424_v42, %v1384_v20  ;;  %v1328_v49 = vadd.f32 %v1310_v35, %v1286_v41  ;;  %v1767_v55 = vld [vmem:[%s3355_s28 + $0x40] sm:$0xff]  ;;  %v1769_v21 = vld [vmem:[%s3355_s28 + $0x50] sm:$0xff]  ;;  %v1770_v44 = vld [vmem:[%s3355_s28 + $0x58] sm:$0xff] }
 0x16d   : > { %2406 = vmatmul.mubr.msk.f32.gmra.mrb[12].mxu1 %vm937_vm2, %v1532_v22  ;;  %1518 = vst.msk [vmem:[#allocation3 + $0x68] sm:$0xff] %vm937_vm2, %v1500_v38  ;;  %v1501_v61 = vmin.f32 %v1483_v62, 6.0  ;;  %v1534_v51 = vld [vmem:[#allocation3 + $0x58] sm:$0xff]  ;;  %v1771_v5 = vld [vmem:[%s3355_s28 + $0x60] sm:$0xff]  ;;  %v1772_v47 = vld [vmem:[%s3355_s28 + $0x68] sm:$0xff] }
 0x16e   : > { %v1443_v13 = vadd.f32 %v1425_v7, %v1385_v33  ;;  %2408 = vmatprep.mubr.msk.f32.mxu1 %vm937_vm2, %v1533_v17  ;;  %v1466_v11 = vadd.f32 %v3004_v58, %v1442_v23  ;;  %v1386_v53 = vadd.f32 %v1368_v4, %v1328_v49  ;;  %v1773_v19 = vld [vmem:[%s3355_s28 + $0x70] sm:$0xff]  ;;  %v1774_v57 = vld [vmem:[%s3355_s28 + $0x78] sm:$0xff]  ;;  %v1775_v31 = vld [vmem:[%s3355_s28 + $0x80] sm:$0xff] }
 0x16f   : > { %1519 = vst.msk [vmem:[#allocation3 + $0x70] sm:$0xff] %vm937_vm2, %v1501_v61  ;;  %v1776_v52 = vld [vmem:[%s3355_s28 + $0x88] sm:$0xff]  ;;  %v2215_v30 = vld [vmem:[%s3485_s8] ss:$0 sm:$0xff] }
 0x170   : > { %v1467_v45 = vadd.f32 %v3004_v58, %v1443_v13  ;;  %v1484_v29 = vmax.f32 %v1466_v11, 0.0  ;;  %v1444_v34 = vadd.f32 %v1426_v16, %v1386_v53  ;;  %v2234_v36 = vld [vmem:[%s3487_s10] ss:$0 sm:$0xff] }
 0x171   : > { %2409 = vmatmul.mubr.msk.f32.gmra.mrb[14].mxu1 %vm937_vm2, %v1534_v51  ;;  %v3401_v42 = vadd.f32 %v2234_v36, %v2215_v30 }
 0x172   : > { %v1485_v10 = vmax.f32 %v1467_v45, 0.0  ;;  %v1502_v58 = vmin.f32 %v1484_v29, 6.0  ;;  %v1535_v40 = vld [vmem:[#allocation3 + $0x60] sm:$0xff]  ;;  %v1468_v60 = vadd.f32 %v2565_v63, %v1444_v34 }
 0x173   : > { %2411 = vmatprep.mubr.msk.f32.mxu1 %vm937_vm2, %v1535_v40 }
 0x174   : > { %v1503_v1 = vmin.f32 %v1485_v10, 6.0  ;;  %1520 = vst.msk [vmem:[#allocation3 + $0x78] sm:$0xff] %vm937_vm2, %v1502_v58  ;;  %v1486_v39 = vmax.f32 %v1468_v60, 0.0  ;;  %v1536_v27 = vld [vmem:[#allocation3 + $0x68] sm:$0xff] }
 0x175   : > { %2412 = vmatmul.mubr.msk.f32.gmra.mrb[16].mxu1 %vm937_vm2, %v1536_v27 }
 0x176   : > { %1521 = vst.msk [vmem:[#allocation3 + $0x80] sm:$0xff] %vm937_vm2, %v1503_v1  ;;  %v1504_v8 = vmin.f32 %v1486_v39, 6.0  ;;  %v1537_v0 = vld [vmem:[#allocation3 + $0x70] sm:$0xff] }
 0x177   : > { %2414 = vmatprep.mubr.msk.f32.mxu1 %vm937_vm2, %v1537_v0 }
 0x178   : > { %1522 = vst.msk [vmem:[#allocation3 + $0x88] sm:$0xff] %vm937_vm2, %v1504_v8 }
 0x17b   : > { %v1538_v59 = vld [vmem:[#allocation3 + $0x78] sm:$0xff] }
 0x17c   : > { %2415 = vmatmul.mubr.msk.f32.gmra.mrb[18].mxu1 %vm937_vm2, %v1538_v59 }
 0x17d   : > { %v1539_v43 = vld [vmem:[#allocation3 + $0x80] sm:$0xff] }
 0x17e   : > { %2417 = vmatprep.mubr.msk.f32.mxu1 %vm937_vm2, %v1539_v43 }
 0x17f   : > { %v1540_v12 = vld [vmem:[#allocation3 + $0x88] sm:$0xff] }
 0x180   : > { %2418 = vmatmul.mubr.msk.f32.gmra.mrb[20].mxu1 %vm937_vm2, %v1540_v12 }
 0x181   : > { %2422 = vmatprep.mubr.msk.f32.mxu1 %vm503_vm1, %v1759_v32 }
 0x184   : > { %2423 = vmatmul.mubr.msk.f32.vlgmr.msra.gmra.mrb[4].mxu1 %vm503_vm1, %v1760_v24 }
 0x185   : > { %2425 = vmatprep.mubr.msk.f32.mxu1 %vm503_vm1, %v1761_v9 }
 0x188   : > { %2426 = vmatmul.mubr.msk.f32.gmra.mrb[6].mxu1 %vm503_vm1, %v1762_v25 }
 0x189   : > { %2428 = vmatprep.mubr.msk.f32.mxu1 %vm503_vm1, %v1763_v37 }
 0x18c   : > { %2429 = vmatmul.mubr.msk.f32.gmra.mrb[8].mxu1 %vm503_vm1, %v1764_v14 }
 0x18d   : > { %2431 = vmatprep.mubr.msk.f32.mxu1 %vm503_vm1, %v1765_v48 }
 0x190   : > { %2432 = vmatmul.mubr.msk.f32.gmra.mrb[10].mxu1 %vm503_vm1, %v1766_v15 }
 0x191   : > { %2434 = vmatprep.mubr.msk.f32.mxu1 %vm503_vm1, %v1767_v55 }
 0x194   : > { %2435 = vmatmul.mubr.msk.f32.gmra.mrb[12].mxu1 %vm503_vm1, %v1768_v54 }
 0x195   : > { %2437 = vmatprep.mubr.msk.f32.mxu1 %vm503_vm1, %v1769_v21 }
 0x198   : > { %2438 = vmatmul.mubr.msk.f32.gmra.mrb[14].mxu1 %vm503_vm1, %v1770_v44 }
 0x199   : > { %2440 = vmatprep.mubr.msk.f32.mxu1 %vm503_vm1, %v1771_v5 }
 0x19c   : > { %2441 = vmatmul.mubr.msk.f32.gmra.mrb[16].mxu1 %vm503_vm1, %v1772_v47 }
 0x19d   : > { %2443 = vmatprep.mubr.msk.f32.mxu1 %vm503_vm1, %v1773_v19 }
 0x1a0   : > { %2444 = vmatmul.mubr.msk.f32.gmra.mrb[18].mxu1 %vm503_vm1, %v1774_v57 }
 0x1a1   : > { %2446 = vmatprep.mubr.msk.f32.mxu1 %vm503_vm1, %v1775_v31 }
 0x1a4   : > { %2447 = vmatmul.mubr.msk.f32.gmra.mrb[20].mxu1 %vm503_vm1, %v1776_v52 }
 0x257   : > { %v2424_v6 = vpop.f32.mrb[4].mxu1 }
 0x258   : > { %v2455_v50 = vadd.f32 %v2424_v6, %v2215_v30  ;;  %v1905_v22 = vpop.f32.mrb[5].mxu1 }
 0x259   : > { %v2457_v3 = vadd.f32 %v2215_v30, %v1905_v22 }
 0x25a   : > { %v2456_v56 = vadd.f32 %v2455_v50, %v2234_v36 }
 0x25b   : > { %v2458_v18 = vadd.f32 %v2457_v3, %v2234_v36  ;;  %v2427_v20 = vpop.f32.mrb[6].mxu1 }
 0x25c   : > { %v2013_v33 = vmax.f32 %v2456_v56, 0.0  ;;  %v2460_v7 = vadd.f32 %v3401_v42, %v2427_v20  ;;  %v1915_v2 = vpop.f32.mrb[7].mxu1 }
 0x25d   : > { %v2012_v35 = vmax.f32 %v2458_v18, 0.0  ;;  %v2462_v41 = vadd.f32 %v3401_v42, %v1915_v2 }
 0x25e   : > { %v2031_v17 = vmin.f32 %v2013_v33, 6.0  ;;  %v2015_v26 = vmax.f32 %v2460_v7, 0.0 }
 0x25f   : > { %v2030_v28 = vmin.f32 %v2012_v35, 6.0  ;;  %v2014_v46 = vmax.f32 %v2462_v41, 0.0  ;;  %v2430_v23 = vpop.f32.mrb[8].mxu1 }
 0x260   : > { %2050 = vst.msk [vmem:[%s3409_s16 + $0x8] sm:$0xff] %vm2048_vm4, %v2031_v17  ;;  %v2033_v13 = vmin.f32 %v2015_v26, 6.0  ;;  %v2464_v4 = vadd.f32 %v3401_v42, %v2430_v23  ;;  %v1925_v49 = vpop.f32.mrb[9].mxu1 }
 0x261   : > { %2049 = vst.msk [vmem:[%s3409_s16] sm:$0xff] %vm2048_vm4, %v2030_v28  ;;  %v2032_v38 = vmin.f32 %v2014_v46, 6.0  ;;  %v2466_v62 = vadd.f32 %v3401_v42, %v1925_v49 }
 0x262   : > { %2052 = vst.msk [vmem:[%s3409_s16 + $0x18] sm:$0xff] %vm2048_vm4, %v2033_v13  ;;  %v2017_v11 = vmax.f32 %v2464_v4, 0.0 }
 0x263   : > { %2051 = vst.msk [vmem:[%s3409_s16 + $0x10] sm:$0xff] %vm2048_vm4, %v2032_v38  ;;  %v2016_v45 = vmax.f32 %v2466_v62, 0.0  ;;  %v2433_v16 = vpop.f32.mrb[10].mxu1 }
 0x264   : > { %v2035_v61 = vmin.f32 %v2017_v11, 6.0  ;;  %v2468_v53 = vadd.f32 %v3401_v42, %v2433_v16  ;;  %v1935_v29 = vpop.f32.mrb[11].mxu1 }
 0x265   : > { %v2034_v10 = vmin.f32 %v2016_v45, 6.0  ;;  %v2470_v51 = vadd.f32 %v3401_v42, %v1935_v29 }
 0x266   : > { %2054 = vst.msk [vmem:[%s3409_s16 + $0x28] sm:$0xff] %vm2048_vm4, %v2035_v61  ;;  %v2019_v34 = vmax.f32 %v2468_v53, 0.0 }
 0x267   : > { %2053 = vst.msk [vmem:[%s3409_s16 + $0x20] sm:$0xff] %vm2048_vm4, %v2034_v10  ;;  %v2018_v58 = vmax.f32 %v2470_v51, 0.0  ;;  %v2436_v1 = vpop.f32.mrb[12].mxu1 }
 0x268   : > { %v2037_v40 = vmin.f32 %v2019_v34, 6.0  ;;  %v2472_v63 = vadd.f32 %v3401_v42, %v2436_v1  ;;  %v1945_v60 = vpop.f32.mrb[13].mxu1 }
 0x269   : > { %v2036_v39 = vmin.f32 %v2018_v58, 6.0  ;;  %v2474_v27 = vadd.f32 %v3401_v42, %v1945_v60 }
 0x26a   : > { %2056 = vst.msk [vmem:[%s3409_s16 + $0x38] sm:$0xff] %vm2048_vm4, %v2037_v40  ;;  %v2021_v8 = vmax.f32 %v2472_v63, 0.0 }
 0x26b   : > { %2055 = vst.msk [vmem:[%s3409_s16 + $0x30] sm:$0xff] %vm2048_vm4, %v2036_v39  ;;  %v2020_v0 = vmax.f32 %v2474_v27, 0.0  ;;  %v2439_v59 = vpop.f32.mrb[14].mxu1 }
 0x26c   : > { %v2039_v43 = vmin.f32 %v2021_v8, 6.0  ;;  %v2476_v32 = vadd.f32 %v3401_v42, %v2439_v59  ;;  %v1955_v12 = vpop.f32.mrb[15].mxu1 }
 0x26d   : > { %v2038_v24 = vmin.f32 %v2020_v0, 6.0  ;;  %v2478_v9 = vadd.f32 %v3401_v42, %v1955_v12 }
 0x26e   : > { %2058 = vst.msk [vmem:[%s3409_s16 + $0x48] sm:$0xff] %vm2048_vm4, %v2039_v43  ;;  %v2023_v25 = vmax.f32 %v2476_v32, 0.0 }
 0x26f   : > { %2057 = vst.msk [vmem:[%s3409_s16 + $0x40] sm:$0xff] %vm2048_vm4, %v2038_v24  ;;  %v2022_v37 = vmax.f32 %v2478_v9, 0.0  ;;  %v2442_v14 = vpop.f32.mrb[16].mxu1 }
 0x270   : > { %v2041_v48 = vmin.f32 %v2023_v25, 6.0  ;;  %v2480_v15 = vadd.f32 %v3401_v42, %v2442_v14  ;;  %v1965_v55 = vpop.f32.mrb[17].mxu1 }
 0x271   : > { %v2040_v54 = vmin.f32 %v2022_v37, 6.0  ;;  %v2482_v21 = vadd.f32 %v3401_v42, %v1965_v55 }
 0x272   : > { %2060 = vst.msk [vmem:[%s3409_s16 + $0x58] sm:$0xff] %vm2048_vm4, %v2041_v48  ;;  %v2025_v44 = vmax.f32 %v2480_v15, 0.0 }
 0x273   : > { %2059 = vst.msk [vmem:[%s3409_s16 + $0x50] sm:$0xff] %vm2048_vm4, %v2040_v54  ;;  %v2024_v5 = vmax.f32 %v2482_v21, 0.0  ;;  %v2445_v47 = vpop.f32.mrb[18].mxu1 }
 0x274   : > { %v2043_v19 = vmin.f32 %v2025_v44, 6.0  ;;  %v2484_v57 = vadd.f32 %v3401_v42, %v2445_v47  ;;  %v1975_v31 = vpop.f32.mrb[19].mxu1 }
 0x275   : > { %v2042_v52 = vmin.f32 %v2024_v5, 6.0  ;;  %v2486_v30 = vadd.f32 %v3401_v42, %v1975_v31 }
 0x276   : > { %2062 = vst.msk [vmem:[%s3409_s16 + $0x68] sm:$0xff] %vm2048_vm4, %v2043_v19  ;;  %v2027_v36 = vmax.f32 %v2484_v57, 0.0 }
 0x277   : > { %2061 = vst.msk [vmem:[%s3409_s16 + $0x60] sm:$0xff] %vm2048_vm4, %v2042_v52  ;;  %v2026_v6 = vmax.f32 %v2486_v30, 0.0  ;;  %v2448_v50 = vpop.f32.mrb[20].mxu1 }
 0x278   : > { %v2045_v22 = vmin.f32 %v2027_v36, 6.0  ;;  %v2488_v3 = vadd.f32 %v3401_v42, %v2448_v50  ;;  %v1985_v56 = vpop.f32.mrb[21].mxu1 }
 0x279   : > { %v2044_v18 = vmin.f32 %v2026_v6, 6.0  ;;  %v2490_v20 = vadd.f32 %v3401_v42, %v1985_v56 }
 0x27a   : > { %2064 = vst.msk [vmem:[%s3409_s16 + $0x78] sm:$0xff] %vm2048_vm4, %v2045_v22  ;;  %v2029_v33 = vmax.f32 %v2488_v3, 0.0 }
 0x27b   : > { %2063 = vst.msk [vmem:[%s3409_s16 + $0x70] sm:$0xff] %vm2048_vm4, %v2044_v18  ;;  %v2028_v7 = vmax.f32 %v2490_v20, 0.0 }
 0x27c   : > { %v2047_v2 = vmin.f32 %v2029_v33, 6.0 }
 0x27d   : > { %v2046_v35 = vmin.f32 %v2028_v7, 6.0 }
 0x27e   : > { %2066 = vst.msk [vmem:[%s3409_s16 + $0x88] sm:$0xff] %vm2048_vm4, %v2047_v2 }
 0x27f   : > { %2065 = vst.msk [vmem:[%s3409_s16 + $0x80] sm:$0xff] %vm2048_vm4, %v2046_v35 }
 0x280 PF: > { %s21_s21 = sadd.s32 1, %s2604_s21   ;;  %s3490_s17 = smov %s2596_s19 }
 0x281   : > { %p18_p7 = scmp.ge.s32.totalorder %s21_s21, 6   ;;  %s3491_s18 = smov %s2600_s20 }
 0x282   : > { %s3492_s19 = smov %s3495_s22  ;;  %s3493_s20 = smov %s3499_s23 }
 0x283   :  { %20 = sbr.rel (!%p18_p7) target bundleno = 3 (0x3), region = 99 }

</bundles_post_ra>
